<compile_context>
chip_gen: v7x
topology: tpu7x:2x2x1
jax: 0.10.0
libtpu: 0.0.40
codegen_flags: <defaults>
</compile_context>

<pallas_src>
import functools

import jax
import jax.numpy as jnp
from jax import lax
from jax.experimental import pallas as pl
from jax.experimental.pallas import tpu as pltpu

_INV_SQRT2 = 0.7071067811865476


def _round_up(x, m):
    return ((x + m - 1) // m) * m


def _detect_vmem_ceiling_bytes():
    """Generation-aware VMEM ceiling, computed once at import time (never on the
    hot path): leave headroom for Mosaic internal scratch -- ~56 MiB on 64-MiB
    parts (v7x), ~112 MiB on 128-MiB parts (v5e/v6e)."""
    cap = None
    try:
        cap = getattr(pltpu.get_tpu_info(), "vmem_capacity_bytes", None)
    except Exception:
        cap = None
    if cap is None:
        try:
            kind = jax.devices()[0].device_kind.lower()
            cap = 64 * 2**20 if "v7" in kind else 128 * 2**20
        except Exception:
            cap = 128 * 2**20
    if cap <= 64 * 2**20:
        return 56 * 2**20
    return 112 * 2**20


_VMEM_CEILING = _detect_vmem_ceiling_bytes()


def _vmem_estimate_bytes(h, tb):
    """Streaming-design VMEM budget for one grid step."""
    weights = 2 * h * h * 2          # double-buffered (1, h, h) bf16 weight slab
    params = 2 * 3 * h * 4           # double-buffered (1, 3, h) f32 packed params
    io = 2 * 2 * tb * h * 4          # x-in + out tiles, 2 pipeline buffers each
    res = tb * h * 4                 # residual-stream scratch
    live = 5 * tb * h * 4            # y, y*y, bf16 LHS, GELU temporaries
    return weights + params + io + res + live


def _vmem_limit_bytes(h, tb):
    est = _vmem_estimate_bytes(h, tb)
    return int(min(_VMEM_CEILING, max(32 * 2**20, 2 * est)))


def _pick_block_b(B, h, ceiling):
    """Batch-tile rows: prefer 256-512 rows (fills the 256-wide MXU on v6e/v7x and
    amortizes the ~0.35us per-grid-step overhead) with >=2 grid steps so the
    'parallel' batch axis can shard across the two TensorCores on v7x; multiples
    of 16 rows so the f32->bf16 LHS cast packs sublanes cleanly; shrink whenever
    the streaming VMEM estimate would exceed the generation ceiling."""
    def fits(tb):
        return _vmem_estimate_bytes(h, tb) <= ceiling

    for tb in (512, 256, 128):
        if B >= 2 * tb and fits(tb):
            return tb
    if B >= 32:
        tb = _round_up((B + 1) // 2, 16)   # still >=2 grid steps
    else:
        tb = _round_up(max(B, 1), 16)
    while tb > 16 and not fits(tb):
        tb = max(16, _round_up(tb // 2, 16))
    return tb


def _resmlp_block_kernel(x_ref, w_ref, p_ref, o_ref, res_ref, *, eps):
    """One residual block per grid step (innermost 'arbitrary' axis == block index).

        res <- res + GELU(LayerNorm(res @ Wt[k] + b[k]))     (Dropout == identity)

    The residual stream lives in the f32 VMEM scratch `res_ref`, initialized from
    the x tile at k == 0 and written to the output tile at k == n_blocks - 1.
    """
    k = pl.program_id(1)
    n_blocks = pl.num_programs(1)
    h = w_ref.shape[-1]
    inv_h = 1.0 / float(h)

    @pl.when(k == 0)
    def _():
        res_ref[...] = x_ref[...].astype(jnp.float32)

    x = res_ref[...]                          # (tb, h) f32 residual stream
    w = w_ref[0]                              # (h, h) bf16, pre-transposed
    p = p_ref[...]                            # (1, 3, h) f32 packed bias/gamma/beta
    bias, gamma, beta = p[:, 0, :], p[:, 1, :], p[:, 2, :]   # each (1, h)

    # Linear: bf16 operands -> MXU, f32 accumulation.
    y = jnp.dot(x.astype(jnp.bfloat16), w, preferred_element_type=jnp.float32)
    y = y + bias

    # Fused LayerNorm statistics: one pair of cross-lane reductions,
    # var = E[y^2] - mean^2 clamped at 0 (cancellation), rsqrt on the EUP slot.
    s1 = jnp.sum(y, axis=-1, keepdims=True)
    s2 = jnp.sum(y * y, axis=-1, keepdims=True)
    mean = s1 * inv_h
    var = jnp.maximum(s2 * inv_h - mean * mean, 0.0)
    y = (y - mean) * lax.rsqrt(var + eps)
    y = y * gamma + beta

    # Exact (erf-based) GELU -- PyTorch nn.GELU() default.
    # TODO(synk): if bundle dumps show the epilogue is VALU-bound on v5e/v6e,
    # switch to the tanh approximation (rides the idle EUP slot).
    y = 0.5 * y * (1.0 + lax.erf(y * _INV_SQRT2))

    # Dropout(p=0.15) is identity in eval mode; residual add.
    res_ref[...] = x + y

    @pl.when(k == n_blocks - 1)
    def _():
        o_ref[...] = res_ref[...].astype(o_ref.dtype)


def prepare_resmlp_params(W, b, gamma, beta):
    """One-time parameter prep (at load time, NOT per call):
      - transpose to (n_blocks, h_in, h_out) so the kernel computes x @ Wt == x @ W.T
      - cast weights to bf16 for the MXU (accumulation stays f32 in-kernel)
      - pack bias / gamma / beta into a single (n_blocks, 3, h) f32 array
    """
    n_blocks, h, _ = W.shape
    Wt = jnp.transpose(W, (0, 2, 1)).astype(jnp.bfloat16)
    packed = jnp.stack(
        [b.astype(jnp.float32), gamma.astype(jnp.float32), beta.astype(jnp.float32)],
        axis=1,
    )  # (n_blocks, 3, h)
    return Wt, packed


@functools.partial(jax.jit, static_argnames=("eps", "block_b"))
def resmlp_forward(x, Wt, packed, *, eps=1e-5, block_b=None):
    """x: (B, h); Wt: (n_blocks, h, h) bf16 pre-transposed; packed: (n_blocks, 3, h) f32."""
    n_blocks, h, h2 = Wt.shape
    assert h == h2, "ResMLP blocks are square (h x h)"
    B = x.shape[0]

    tb = block_b if block_b is not None else _pick_block_b(B, h, _VMEM_CEILING)
    tb = _round_up(tb, 16)
    Bp = _round_up(B, tb)
    xp = x if Bp == B else jnp.pad(x, ((0, Bp - B), (0, 0)))

    kernel = functools.partial(_resmlp_block_kernel, eps=eps)
    grid = (Bp // tb, n_blocks)   # (parallel batch tiles, arbitrary block stream)

    out = pl.pallas_call(
        kernel,
        out_shape=jax.ShapeDtypeStruct((Bp, h), x.dtype),
        grid_spec=pltpu.PrefetchScalarGridSpec(
            num_scalar_prefetch=0,
            grid=grid,
            in_specs=[
                # x tile: constant in k => DMA'd once per batch tile.
                pl.BlockSpec((tb, h), lambda i, k: (i, 0)),
                # One block's weights per step (double-buffered by the pipeline).
                pl.BlockSpec((1, h, h), lambda i, k: (k, 0, 0)),
                # One block's packed bias/gamma/beta per step.
                pl.BlockSpec((1, 3, h), lambda i, k: (k, 0, 0)),
            ],
            # Output index_map constant in k: resident across the block axis,
            # written only at k == n_blocks - 1.
            out_specs=pl.BlockSpec((tb, h), lambda i, k: (i, 0)),
            scratch_shapes=[pltpu.VMEM((tb, h), jnp.float32)],   # residual stream
        ),
        compiler_params=pltpu.CompilerParams(
            dimension_semantics=("parallel", "arbitrary"),
            vmem_limit_bytes=_vmem_limit_bytes(h, tb),
        ),
    )(xp, Wt, packed)
    return out[:B] if Bp != B else out


def _reference(x, W, b, gamma, beta, eps=1e-5, matmul_dtype=jnp.float32):
    """Pure-JAX reference mirroring the PyTorch eval forward. With
    matmul_dtype=bf16 it also mirrors the kernel's MXU precision exactly."""
    x = x.astype(jnp.float32)
    for blk in range(W.shape[0]):
        y = jnp.dot(x.astype(matmul_dtype), W[blk].T.astype(matmul_dtype),
                    preferred_element_type=jnp.float32) + b[blk]
        mean = jnp.mean(y, axis=-1, keepdims=True)
        var = jnp.mean(jnp.square(y - mean), axis=-1, keepdims=True)
        y = (y - mean) / jnp.sqrt(var + eps)
        y = y * gamma[blk] + beta[blk]
        y = 0.5 * y * (1.0 + lax.erf(y * _INV_SQRT2))
        x = x + y
    return x


if __name__ == "__main__":
    # Small but MXU-friendly demo shapes (module default n_blocks=4):
    # 3 batch tiles of 128 rows x 4 streamed blocks -> exercises both grid axes.
    B, H, N_BLOCKS = 384, 256, 4

    key = jax.random.PRNGKey(0)
    kx, kw, kb, kg, kbe = jax.random.split(key, 5)

    x = jax.random.normal(kx, (B, H), dtype=jnp.float32)

    # nn.Linear-style init; non-trivial LayerNorm affine so gamma/beta are exercised.
    bound = 1.0 / jnp.sqrt(jnp.float32(H))
    W = jax.random.uniform(kw, (N_BLOCKS, H, H), jnp.float32, -bound, bound)
    b = jax.random.uniform(kb, (N_BLOCKS, H), jnp.float32, -bound, bound)
    gamma = 1.0 + 0.1 * jax.random.normal(kg, (N_BLOCKS, H), dtype=jnp.float32)
    beta = 0.1 * jax.random.normal(kbe, (N_BLOCKS, H), dtype=jnp.float32)

    Wt, packed = prepare_resmlp_params(W, b, gamma, beta)   # once, at "load time"
    out = jax.block_until_ready(resmlp_forward(x, Wt, packed))

    assert out.shape == (B, H)

    # Tight check vs a reference that mirrors the kernel's bf16-matmul / f32-accum path.
    ref_bf16 = _reference(x, W, b, gamma, beta, matmul_dtype=jnp.bfloat16)
    assert jnp.allclose(out, ref_bf16, atol=2e-3, rtol=2e-3), "mismatch vs bf16-matmul reference"

    # Loose sanity check vs exact-f32 math (difference == expected bf16 matmul drift).
    ref_f32 = _reference(x, W, b, gamma, beta, matmul_dtype=jnp.float32)
    assert jnp.allclose(out, ref_f32, atol=1e-1, rtol=1e-1), "mismatch vs f32 reference"

    print("KERNEL_OK")
</pallas_src>

<mosaic_0001>
module attributes {stable_mosaic.version = 11 : i64} {
  func.func @_resmlp_block_kernel(%arg0: i32, %arg1: i32, %arg2: memref<128x256xf32, #tpu.memory_space<vmem>>, %arg3: memref<1x256x256xbf16, #tpu.memory_space<vmem>>, %arg4: memref<1x3x256xf32, #tpu.memory_space<vmem>>, %arg5: memref<128x256xf32, #tpu.memory_space<vmem>>, %arg6: memref<128x256xf32, #tpu.memory_space<vmem>>) attributes {dimension_semantics = [#tpu.dimension_semantics<parallel>, #tpu.dimension_semantics<arbitrary>], iteration_bounds = array<i64: 3, 4>, scalar_prefetch = 0 : i64, scratch_operands = 1 : i64, tpu.core_type = #tpu.core_type<tc>, window_params = [{transform_indices = @transform_0, window_bounds = array<i64: 128, 256>}, {transform_indices = @transform_1, window_bounds = array<i64: 1, 256, 256>}, {transform_indices = @transform_2, window_bounds = array<i64: 1, 3, 256>}, {transform_indices = @transform_3, window_bounds = array<i64: 128, 256>}]} {
    %c0_i32 = arith.constant 0 : i32
    %0 = arith.cmpi eq, %arg1, %c0_i32 : i32
    %1 = arith.extui %0 : i1 to i32
    %c0_i32_0 = arith.constant 0 : i32
    %2 = arith.cmpi ne, %1, %c0_i32_0 : i32
    scf.if %2 {
      %c0_20 = arith.constant 0 : index
      %c0_21 = arith.constant 0 : index
      %54 = vector.load %arg2[%c0_20, %c0_21] : memref<128x256xf32, #tpu.memory_space<vmem>>, vector<128x256xf32>
      %c0_22 = arith.constant 0 : index
      %c0_23 = arith.constant 0 : index
      %55 = vector.load %arg6[%c0_22, %c0_23] : memref<128x256xf32, #tpu.memory_space<vmem>>, vector<128x256xf32>
      tpu.vector_store %arg6[%c0_22, %c0_23], %54 {strides = array<i32>} : memref<128x256xf32, #tpu.memory_space<vmem>>, vector<128x256xf32>,
    } else {
    }
    %c0 = arith.constant 0 : index
    %c0_1 = arith.constant 0 : index
    %3 = vector.load %arg6[%c0, %c0_1] : memref<128x256xf32, #tpu.memory_space<vmem>>, vector<128x256xf32>
    %c0_2 = arith.constant 0 : index
    %c0_3 = arith.constant 0 : index
    %c0_4 = arith.constant 0 : index
    %4 = vector.load %arg3[%c0_2, %c0_3, %c0_4] : memref<1x256x256xbf16, #tpu.memory_space<vmem>>, vector<1x256x256xbf16>
    %5 = vector.shape_cast %4 : vector<1x256x256xbf16> to vector<256x256xbf16>
    %c0_5 = arith.constant 0 : index
    %c0_6 = arith.constant 0 : index
    %c0_7 = arith.constant 0 : index
    %6 = vector.load %arg4[%c0_5, %c0_6, %c0_7] : memref<1x3x256xf32, #tpu.memory_space<vmem>>, vector<1x3x256xf32>
    %7 = vector.extract_strided_slice %6 {offsets = [0, 0, 0], sizes = [1, 1, 256], strides = [1, 1, 1]} : vector<1x3x256xf32> to vector<1x1x256xf32>
    %8 = vector.shape_cast %7 : vector<1x1x256xf32> to vector<1x256xf32>
    %9 = vector.extract_strided_slice %6 {offsets = [0, 1, 0], sizes = [1, 1, 256], strides = [1, 1, 1]} : vector<1x3x256xf32> to vector<1x1x256xf32>
    %10 = vector.shape_cast %9 : vector<1x1x256xf32> to vector<1x256xf32>
    %11 = vector.extract_strided_slice %6 {offsets = [0, 2, 0], sizes = [1, 1, 256], strides = [1, 1, 1]} : vector<1x3x256xf32> to vector<1x1x256xf32>
    %12 = vector.shape_cast %11 : vector<1x1x256xf32> to vector<1x256xf32>
    %13 = arith.truncf %3 : vector<128x256xf32> to vector<128x256xbf16>
    %cst = arith.constant dense<0.000000e+00> : vector<128x256xf32>
    %14 = tpu.matmul %13, %5, %cst {dimension_numbers = #tpu.dot_dimension_numbers<[1], [0], [0], [1], [0, 0, 1, 1], [], []>} : vector<128x256xbf16>, vector<256x256xbf16>, vector<128x256xf32> -> vector<128x256xf32>
    %15 = vector.broadcast %8 : vector<1x256xf32> to vector<128x256xf32>
    %16 = arith.addf %14, %15 : vector<128x256xf32>
    %cst_8 = arith.constant dense<0.000000e+00> : vector<128xf32>
    %17 = vector.multi_reduction <add>, %16, %cst_8 [1] : vector<128x256xf32> to vector<128xf32>
    %18 = vector.shape_cast %17 : vector<128xf32> to vector<128x1xf32>
    %19 = arith.mulf %16, %16 : vector<128x256xf32>
    %cst_9 = arith.constant dense<0.000000e+00> : vector<128xf32>
    %20 = vector.multi_reduction <add>, %19, %cst_9 [1] : vector<128x256xf32> to vector<128xf32>
    %21 = vector.shape_cast %20 : vector<128xf32> to vector<128x1xf32>
    %cst_10 = arith.constant 3.906250e-03 : f32
    %22 = vector.broadcast %cst_10 : f32 to vector<128x1xf32>
    %23 = arith.mulf %18, %22 : vector<128x1xf32>
    %cst_11 = arith.constant 3.906250e-03 : f32
    %24 = vector.broadcast %cst_11 : f32 to vector<128x1xf32>
    %25 = arith.mulf %21, %24 : vector<128x1xf32>
    %26 = arith.mulf %23, %23 : vector<128x1xf32>
    %27 = arith.subf %25, %26 : vector<128x1xf32>
    %cst_12 = arith.constant 0.000000e+00 : f32
    %28 = vector.broadcast %cst_12 : f32 to vector<128x1xf32>
    %29 = arith.maximumf %27, %28 : vector<128x1xf32>
    %30 = vector.broadcast %23 : vector<128x1xf32> to vector<128x256xf32>
    %31 = arith.subf %16, %30 : vector<128x256xf32>
    %cst_13 = arith.constant 9.99999974E-6 : f32
    %32 = vector.broadcast %cst_13 : f32 to vector<128x1xf32>
    %33 = arith.addf %29, %32 : vector<128x1xf32>
    %34 = math.rsqrt %33 : vector<128x1xf32>
    %35 = vector.broadcast %34 : vector<128x1xf32> to vector<128x256xf32>
    %36 = arith.mulf %31, %35 : vector<128x256xf32>
    %37 = vector.broadcast %10 : vector<1x256xf32> to vector<128x256xf32>
    %38 = arith.mulf %36, %37 : vector<128x256xf32>
    %39 = vector.broadcast %12 : vector<1x256xf32> to vector<128x256xf32>
    %40 = arith.addf %38, %39 : vector<128x256xf32>
    %cst_14 = arith.constant 5.000000e-01 : f32
    %41 = vector.broadcast %cst_14 : f32 to vector<128x256xf32>
    %42 = arith.mulf %41, %40 : vector<128x256xf32>
    %cst_15 = arith.constant 0.707106769 : f32
    %43 = vector.broadcast %cst_15 : f32 to vector<128x256xf32>
    %44 = arith.mulf %40, %43 : vector<128x256xf32>
    %45 = math.erf %44 : vector<128x256xf32>
    %cst_16 = arith.constant 1.000000e+00 : f32
    %46 = vector.broadcast %cst_16 : f32 to vector<128x256xf32>
    %47 = arith.addf %46, %45 : vector<128x256xf32>
    %48 = arith.mulf %42, %47 : vector<128x256xf32>
    %49 = arith.addf %3, %48 : vector<128x256xf32>
    %c0_17 = arith.constant 0 : index
    %c0_18 = arith.constant 0 : index
    %50 = vector.load %arg6[%c0_17, %c0_18] : memref<128x256xf32, #tpu.memory_space<vmem>>, vector<128x256xf32>
    tpu.vector_store %arg6[%c0_17, %c0_18], %49 {strides = array<i32>} : memref<128x256xf32, #tpu.memory_space<vmem>>, vector<128x256xf32>,
    %c3_i32 = arith.constant 3 : i32
    %51 = arith.cmpi eq, %arg1, %c3_i32 : i32
    %52 = arith.extui %51 : i1 to i32
    %c0_i32_19 = arith.constant 0 : i32
    %53 = arith.cmpi ne, %52, %c0_i32_19 : i32
    scf.if %53 {
      %c0_20 = arith.constant 0 : index
      %c0_21 = arith.constant 0 : index
      %54 = vector.load %arg6[%c0_20, %c0_21] : memref<128x256xf32, #tpu.memory_space<vmem>>, vector<128x256xf32>
      %c0_22 = arith.constant 0 : index
      %c0_23 = arith.constant 0 : index
      %55 = vector.load %arg5[%c0_22, %c0_23] : memref<128x256xf32, #tpu.memory_space<vmem>>, vector<128x256xf32>
      tpu.vector_store %arg5[%c0_22, %c0_23], %54 {strides = array<i32>} : memref<128x256xf32, #tpu.memory_space<vmem>>, vector<128x256xf32>,
    } else {
    }
    return
  }
  func.func @transform_0(%arg0: i32, %arg1: i32) -> (i32, i32) {
    %c0_i32 = arith.constant 0 : i32
    %c0_i32_0 = arith.constant 0 : i32
    return %arg0, %c0_i32 : i32, i32
  }
  func.func @transform_1(%arg0: i32, %arg1: i32) -> (i32, i32, i32) {
    %c0_i32 = arith.constant 0 : i32
    %c0_i32_0 = arith.constant 0 : i32
    %c0_i32_1 = arith.constant 0 : i32
    return %arg1, %c0_i32, %c0_i32_0 : i32, i32, i32
  }
  func.func @transform_2(%arg0: i32, %arg1: i32) -> (i32, i32, i32) {
    %c0_i32 = arith.constant 0 : i32
    %c0_i32_0 = arith.constant 0 : i32
    %c0_i32_1 = arith.constant 0 : i32
    return %arg1, %c0_i32, %c0_i32_0 : i32, i32, i32
  }
  func.func @transform_3(%arg0: i32, %arg1: i32) -> (i32, i32) {
    %c0_i32 = arith.constant 0 : i32
    %c0_i32_0 = arith.constant 0 : i32
    return %arg0, %c0_i32 : i32, i32
  }
}

</mosaic_0001>

<bundles_post_ra>
// kernel: resmlp_forward.1
= control target key start
LH: loop header
LB: loop body
LE: loop exit
PB: predicated region body
PF: predicated region fallthrough
CT: control target
= control target key end

     0   :  { %s3107_s0 = inlined_call_operand.hbm [shape: f32[384,256], index: 0, kind: input, shape index: {}]   ;;  %s3108_s1 = inlined_call_operand.hbm [shape: bf16[4,256,256], index: 1, kind: input, shape index: {}]   ;;  %s3109_s2 = inlined_call_operand.vmem [shape: f32[4,3,256], index: 2, kind: input, shape index: {}]   ;;  %s3110_s3 = inlined_call_operand.hbm [shape: f32[384,256], index: 3, kind: output, shape index: {}]  }
   0x1   :  { %3128 = sst [smem:[#allocation24_spill]] %s3107_s0 }
   0x2   :  { %8 = vsyncpa [#allocation4], 0 }
   0x3   :  { %10 = vsyncpa [#allocation4 + $0x1], 0 }
   0x4   :  { %11 = vsyncpa [#allocation7], 0 }
   0x5   :  { %13 = vsyncpa [#allocation7 + $0x1], 0 }
   0x6   :  { %14 = vsyncpa [#allocation5], 0 }
   0x7   :  { %16 = vsyncpa [#allocation5 + $0x1], 0  ;;  %s2125_s12 = smov 0   ;;  %s2127_s13 = smov 0  }
   0x8   :  { %s2129_s14 = smov 0   ;;  %s2131_s15 = smov 0  }
   0x9   :  { %s2133_s16 = smov 0   ;;  %s2135_s17 = smov 0  }
   0xa   :  { %s2137_s18 = smov 0   ;;  %s2139_s19 = smov 0  }
   0xb   :  { %s2141_s20 = smov 0   ;;  %s2143_s21 = smov 0  }
   0xc   :  { %s2145_s22 = smov 0  }
   0xd LB: > { %3129 = sst [smem:[#allocation12_spill]] %s2066_s15  ;;  %s1535_s23 = sadd.s32 4294967295, %s2094_s22   ;;  %s2094_s22 = sphi %s2145_s22, %s22_s22   ;;  %s2090_s21 = sphi %s2143_s21, %s3181_s21   ;;  %s2086_s20 = sphi %s2141_s20, %s3180_s20   ;;  %s2082_s19 = sphi %s2139_s19, %s3179_s19   ;;  %s2078_s18 = sphi %s2137_s18, %s3178_s18   ;;  %s2074_s17 = sphi %s2135_s17, %s3177_s17   ;;  %s2070_s16 = sphi %s2133_s16, %s3176_s16   ;;  %s2066_s15 = sphi %s2131_s15, %s3175_s15   ;;  %s2062_s14 = sphi %s2129_s14, %s3174_s14   ;;  %s2058_s13 = sphi %s2127_s13, %s3173_s13   ;;  %s2054_s12 = sphi %s2125_s12, %s3172_s12  }
   0xe   : > { %s1536_s24 = sadd.s32 4294967294, %s2094_s22   ;;  %s34_s25 = sadd.s32 1, %s2090_s21 }
   0xf   : > { %p48_p0 = scmp.ne.s32.totalorder %s2074_s17, %s2070_s16  ;;  %p3112_p1 = scmp.eq.s32.totalorder %s2094_s22, 0 }
  0x10   : > { %p54_p2 = scmp.ne.s32.totalorder %s2070_s16, %s2066_s15  ;;  %p2189_p3 = scmp.eq.s32.totalorder %s1535_s23, 0 }
  0x11   : > { %p2195_p4 = por %p3112_p1, %p48_p0  ;;  %p130_p5 = scmp.eq.s32.totalorder %s1535_s23, 11 }
  0x12   : > { %p2201_p6 = por %p2189_p3, %p54_p2  ;;  %p136_p7 = scmp.eq.s32.totalorder %s1536_s24, 11 }
  0x13   : > { %p2205_p8 = por %p130_p5, %p48_p0  ;;  %p3111_p10 = scmp.lt.s32.totalorder %s2094_s22, 12 }
  0x14   : > { %s3132_s29 = scalar_select %p2201_p6, 1, 0 }
  0x15   : > { %s3133_s30 = scalar_select %p2205_p8, 1, 0 }
  0x16   : > { %p2209_p9 = por %p136_p7, %p54_p2  ;;  %s156_s5 = sand.u32 1, %s2074_s17  }
  0x17   : > { %s1593_s6 = sshll.u32 %s2090_s21, 12  ;;  %s1539_s7 = sshll.u32 %s156_s5, 8 }
  0x18   : > { %s3134_s4 = scalar_select %p2209_p9, 1, 0 }
  0x19   : > { %s3136_s0 = sld [smem:[#allocation24_spill]]  ;;  %s160_s11 = scalar_lea.vmem [#allocation3], %s1539_s7 }
  0x1a   : > { %3135 = sst [smem:[#allocation13_spill]] %s3134_s4  ;;  %s168_s23 = sshll.u32 %s160_s11, 4  ;;  %s2229_s23 = int_to_ptr.vmem [resolvable:$true] %s168_s23 }
  0x1b   : > { %p2225_p11 = pnand %p3111_p10, %p2195_p4  ;;  %s2231_s26 = scalar_lea.sflag [#allocation4], %s156_s5 }
  0x1d   : > { %p1910_p13 = pneg %p2225_p11 }
  0x1f   : > { %s2219_s10 = scalar_lea.hbm %s3136_s0, %s1593_s6  ;;  %s1913_s8 = scalar_lea.hbm %s3136_s0, 12288 }
  0x20   : > { %s1908_s6 = scalar_lea.hbm %s2219_s10, 4096  ;;  %p1914_p4 = scmp.lt.u32.totalorder %s2219_s10, %s3136_s0 }
  0x21   : > { %p1909_p12 = scmp.ne.s32.totalorder %s2219_s10, %s1908_s6  ;;  %p1915_p5 = scmp.lt.u32.totalorder %s1913_s8, %s1908_s6 }
  0x22   : > { %p1917_p10 = scmp.lt.u32.totalorder %s1908_s6, %s2219_s10 }
  0x23   : > { %p1911_p0 = pnand %p1910_p13, %p1909_p12  ;;  %p1916_p7 = por %p1915_p5, %p1914_p4 }
  0x25   : > { %p1912_p2 = pneg %p1911_p0  ;;  %p1918_p1 = por %p1917_p10, %p1916_p7 }
  0x27   : > { %p1919_p9 = pnand %p1918_p1, %p1912_p2 }
  0x29   : > { %1922 = shalt.err (!%p1919_p9)
}
  0x2a   : > { %s1923_s5 = scalar_lea.vmem %s2229_s23, 4096  ;;  %s2096_s28 = smov [#allocation3]  }
  0x2b   : > { %p1924_p12 = scmp.ne.s32.totalorder %s2229_s23, %s1923_s5  ;;  %s1928_s7 = sshll.u32 %s2096_s28, 4  ;;  %s1929_s7 = int_to_ptr.vmem [resolvable:$false] %s1928_s7 }
  0x2c   : > { %s1930_s9 = scalar_lea.vmem %s1929_s7, 8192  ;;  %p1931_p6 = scmp.lt.s32.totalorder %s2229_s23, %s1929_s7 }
  0x2d   : > { %p1926_p0 = pnand %p1924_p12, %p1910_p13  ;;  %p1932_p4 = scmp.lt.s32.totalorder %s1930_s9, %s1923_s5 }
  0x2f   : > { %p1927_p8 = pneg %p1926_p0  ;;  %p1933_p5 = por %p1932_p4, %p1931_p6 }
  0x31   : > { %p1934_p10 = pnand %p1933_p5, %p1927_p8 }
  0x33   : > { %1937 = shalt.err (!%p1934_p10)
}
  0x34   : > { %s2097_s6 = smov 256   ;;  %s2098_s8 = smov 16  }
  0x35   : > { %1639 = dma.hbm_to_vmem [thread:$0]  (!%p2225_p11), %s2219_s10, 4096, %s2229_s23, %s2231_s26, %s2097_s6, %s2097_s6, %s2098_s8  }
  0x36   : > { %p1546_p1 = scmp.ge.s32.totalorder %s2094_s22, 1  ;;  %p205_p6 = scmp.lt.s32.totalorder %s2094_s22, 13 }
  0x37   : > { %s31_s5 = sadd.s32 1, %s2086_s20  ;;  %s67_s28 = sadd.s32 1, %s2062_s14 }
  0x38   : > { %p2261_p8 = pnand %p1546_p1, %p205_p6  ;;  %p32_p9 = scmp.ge.s32.totalorder %s31_s5, 4 }
  0x39   : > { %p74_p13 = scmp.ne.s32.totalorder %s2062_s14, %s2058_s13  ;;  %p80_p2 = scmp.ne.s32.totalorder %s2058_s13, %s2054_s12 }
  0x3a   : > { %s3183_s5 = smov (%p32_p9, %s31_s5), 0  ;;  %s3185_s25 = smov (!%p32_p9, %s34_s25), %s2090_s21 }
  0x3b   : > { %3139 = sst [smem:[#allocation14_spill]] %s3183_s5  ;;  %s64_s26 = ssub.s32 %s2086_s20, %s3183_s5 }
  0x3c   : > { %p3140_p11 = scmp.eq.s32.totalorder %s2094_s22, 0  ;;  %p36_p12 = scmp.ge.s32.totalorder %s3185_s25, 3 }
  0x3d   : > { %p65_p0 = scmp.eq.s32.totalorder %s64_s26, 0  ;;  %p2286_p4 = por %p80_p2, %p2189_p3 }
  0x3e   : > { %p2280_p7 = por %p74_p13, %p3140_p11  ;;  %s178_s12 = sand.u32 1, %s2062_s14  }
  0x3f   : > { %s3142_s23 = scalar_select %p2286_p4, 1, 0 }
  0x40   : > { %s3187_s25 = smov (%p36_p12, %s3185_s25), 0  ;;  %s1543_s9 = sshll.u32 %s178_s12, 8 }
  0x41   : > { %s2294_s24 = scalar_select %p65_p0, %s2062_s14, %s67_s28  }
  0x42   : > { %s38_s7 = ssub.s32 %s2090_s21, %s3187_s25  ;;  %s1594_s6 = sshll.u32 %s2086_s20, 12 }
  0x43   : > { %p39_p5 = scmp.eq.s32.totalorder %s38_s7, 0  ;;  %s3143_s8 = sadd.s32 1, %s2074_s17 }
  0x44   : > { %s2307_s27 = scalar_lea.hbm %s3108_s1, %s1594_s6  ;;  %s182_s4 = scalar_lea.vmem [#allocation6], %s1543_s9 }
  0x45   : > { %s2302_s0 = scalar_select %p39_p5, %s2074_s17, %s3143_s8  }
  0x46   : > { %s189_s15 = sshll.u32 %s182_s4, 4  ;;  %p3144_p3 = scmp.lt.s32.totalorder %s2094_s22, 12  ;;  %s2309_s15 = int_to_ptr.vmem [resolvable:$true] %s189_s15 }
  0x47   : > { %s2319_s7 = scalar_lea.sflag [#allocation7], %s178_s12  ;;  %s1938_s5 = scalar_lea.hbm %s2307_s27, 4096 }
  0x48   : > { %p2315_p10 = pnand %p3144_p3, %p2280_p7  ;;  %p1939_p1 = scmp.ne.s32.totalorder %s2307_s27, %s1938_s5 }
  0x49   : > { %s1943_s10 = scalar_lea.hbm %s3108_s1, 16384  ;;  %p1944_p2 = scmp.lt.u32.totalorder %s2307_s27, %s3108_s1 }
  0x4a   : > { %p1940_p6 = pneg %p2315_p10  ;;  %p1945_p11 = scmp.lt.u32.totalorder %s1943_s10, %s1938_s5 }
  0x4b   : > { %p1947_p12 = scmp.lt.u32.totalorder %s1938_s5, %s2307_s27 }
  0x4c   : > { %p1941_p9 = pnand %p1940_p6, %p1939_p1  ;;  %p1946_p7 = por %p1945_p11, %p1944_p2 }
  0x4e   : > { %p1942_p13 = pneg %p1941_p9  ;;  %p1948_p0 = por %p1947_p12, %p1946_p7 }
  0x50   : > { %p1949_p5 = pnand %p1948_p0, %p1942_p13 }
  0x52   : > { %1952 = shalt.err (!%p1949_p5)
}
  0x53   : > { %s1953_s12 = scalar_lea.vmem %s2309_s15, 4096  ;;  %s2099_s26 = smov [#allocation6]  }
  0x54   : > { %p1954_p3 = scmp.ne.s32.totalorder %s2309_s15, %s1953_s12  ;;  %s1958_s4 = sshll.u32 %s2099_s26, 4  ;;  %s1959_s4 = int_to_ptr.vmem [resolvable:$false] %s1958_s4 }
  0x55   : > { %s1960_s9 = scalar_lea.vmem %s1959_s4, 8192  ;;  %p1961_p4 = scmp.lt.s32.totalorder %s2309_s15, %s1959_s4 }
  0x56   : > { %p1956_p1 = pnand %p1954_p3, %p1940_p6  ;;  %p1962_p2 = scmp.lt.s32.totalorder %s1960_s9, %s1953_s12 }
  0x58   : > { %p1957_p9 = pneg %p1956_p1  ;;  %p1963_p11 = por %p1962_p2, %p1961_p4 }
  0x5a   : > { %p1964_p7 = pnand %p1963_p11, %p1957_p9 }
  0x5c   : > { %1967 = shalt.err (!%p1964_p7)
}
  0x5d   : > { %s2100_s5 = smov 128   ;;  %s2101_s10 = smov 8  }
  0x5e   : > { %1642 = dma.hbm_to_vmem [thread:$0]  (!%p2315_p10), %s2307_s27, 4096, %s2309_s15, %s2319_s7, %s2100_s5, %s2100_s5, %s2101_s10  }
  0x5f   : > { %209 = sbr.rel (%p2261_p8) target bundleno = 731 (0x2db), region = 32 }
  0x66   : > { %s2350_s6 = sand.u32 1, %s2070_s16   ;;  %p3146_p4 = scmp.ne.s32.totalorder %s3132_s29, 0 }
  0x67   : > { %s1547_s8 = sshll.u32 %s2350_s6, 8  ;;  %s212_s12 = scalar_lea.sflag [#allocation4], %s2350_s6 }
  0x68   : > { %s2354_s26 = scalar_lea.vmem [#allocation3], %s1547_s8 }
  0x69   : > { %2041 = dma.done.wait (%p3146_p4), %s212_s12, 4096  }
  0x6a   : > { %2043 = vsyncadd (%p3146_p4), %s212_s12, 4294963200  ;;  %s220_s15 = sand.u32 1, %s2058_s13   ;;  %p3147_p8 = scmp.ne.s32.totalorder %s3142_s23, 0 }
  0x6b   : > { %s1548_s11 = sshll.u32 %s220_s15, 8  ;;  %s221_s27 = scalar_lea.sflag [#allocation7], %s220_s15 }
  0x6c   : > { %s2361_s28 = scalar_lea.vmem [#allocation6], %s1548_s11 }
  0x6d   : > { %2045 = dma.done.wait (%p3147_p8), %s221_s27, 4096  }
  0x6e   : > { %2047 = vsyncadd (%p3147_p8), %s221_s27, 4294963200  ;;  %p258_p10 = scmp.lt.s32.totalorder %s2078_s18, 3  ;;  %s2374_s10 = scalar_lea.vmem [#allocation8], %s1547_s8 }
  0x6f   : > { %p1552_p6 = scmp.ne.s32.totalorder %s2078_s18, 0 }
  0x70   : > { %s259_s7 = scalar_select %p258_p10, %s2078_s18, 3 }
  0x71   : > { %267 = sbr.rel (%p1552_p6) target bundleno = 130 (0x82), region = 44  ;;  %v268_v0 = vld [vmem:[%s2354_s26] sm:$0xff] (!%p1552_p6)  ;;  %v269_v1 = vld [vmem:[%s2354_s26 + $0x8] sm:$0xff] (!%p1552_p6)  ;;  %v270_v2 = vld [vmem:[%s2354_s26 + $0x10] sm:$0xff] (!%p1552_p6) }
  0x72   : > { %s1595_s4 = sshll.u32 %s259_s7, 3  ;;  %300 = vst [vmem:[#allocation2] sm:$0xff] (!%p1552_p6), %v268_v0  ;;  %301 = vst [vmem:[#allocation2 + $0x8] sm:$0xff] (!%p1552_p6), %v269_v1  ;;  %v271_v3 = vld [vmem:[%s2354_s26 + $0x18] sm:$0xff] (!%p1552_p6)  ;;  %v272_v4 = vld [vmem:[%s2354_s26 + $0x20] sm:$0xff] (!%p1552_p6) }
  0x73   : > { %s2372_s5 = scalar_lea.vmem %s3109_s2, %s1595_s4  ;;  %302 = vst [vmem:[#allocation2 + $0x10] sm:$0xff] (!%p1552_p6), %v270_v2  ;;  %v273_v5 = vld [vmem:[%s2354_s26 + $0x28] sm:$0xff] (!%p1552_p6)  ;;  %303 = vst [vmem:[#allocation2 + $0x18] sm:$0xff] (!%p1552_p6), %v271_v3  ;;  %v274_v6 = vld [vmem:[%s2354_s26 + $0x30] sm:$0xff] (!%p1552_p6) }
  0x74   : > { %304 = vst [vmem:[#allocation2 + $0x20] sm:$0xff] (!%p1552_p6), %v272_v4  ;;  %305 = vst [vmem:[#allocation2 + $0x28] sm:$0xff] (!%p1552_p6), %v273_v5  ;;  %v275_v7 = vld [vmem:[%s2354_s26 + $0x38] sm:$0xff] (!%p1552_p6)  ;;  %v276_v8 = vld [vmem:[%s2354_s26 + $0x40] sm:$0xff] (!%p1552_p6) }
  0x75   : > { %306 = vst [vmem:[#allocation2 + $0x30] sm:$0xff] (!%p1552_p6), %v274_v6  ;;  %307 = vst [vmem:[#allocation2 + $0x38] sm:$0xff] (!%p1552_p6), %v275_v7  ;;  %v277_v9 = vld [vmem:[%s2354_s26 + $0x48] sm:$0xff] (!%p1552_p6)  ;;  %v278_v10 = vld [vmem:[%s2354_s26 + $0x50] sm:$0xff] (!%p1552_p6) }
  0x76   : > { %308 = vst [vmem:[#allocation2 + $0x40] sm:$0xff] (!%p1552_p6), %v276_v8  ;;  %v279_v11 = vld [vmem:[%s2354_s26 + $0x58] sm:$0xff] (!%p1552_p6)  ;;  %309 = vst [vmem:[#allocation2 + $0x48] sm:$0xff] (!%p1552_p6), %v277_v9  ;;  %v280_v12 = vld [vmem:[%s2354_s26 + $0x60] sm:$0xff] (!%p1552_p6) }
  0x77   : > { %310 = vst [vmem:[#allocation2 + $0x50] sm:$0xff] (!%p1552_p6), %v278_v10  ;;  %311 = vst [vmem:[#allocation2 + $0x58] sm:$0xff] (!%p1552_p6), %v279_v11  ;;  %v281_v13 = vld [vmem:[%s2354_s26 + $0x68] sm:$0xff] (!%p1552_p6)  ;;  %v282_v14 = vld [vmem:[%s2354_s26 + $0x70] sm:$0xff] (!%p1552_p6) }
  0x78   : > { %312 = vst [vmem:[#allocation2 + $0x60] sm:$0xff] %v280_v12  ;;  %313 = vst [vmem:[#allocation2 + $0x68] sm:$0xff] %v281_v13  ;;  %v283_v15 = vld [vmem:[%s2354_s26 + $0x78] sm:$0xff]  ;;  %v284_v16 = vld [vmem:[%s2354_s26 + $0x80] sm:$0xff] }
  0x79   : > { %314 = vst [vmem:[#allocation2 + $0x70] sm:$0xff] %v282_v14  ;;  %v285_v17 = vld [vmem:[%s2354_s26 + $0x88] sm:$0xff]  ;;  %315 = vst [vmem:[#allocation2 + $0x78] sm:$0xff] %v283_v15  ;;  %v286_v18 = vld [vmem:[%s2354_s26 + $0x90] sm:$0xff] }
  0x7a   : > { %316 = vst [vmem:[#allocation2 + $0x80] sm:$0xff] %v284_v16  ;;  %317 = vst [vmem:[#allocation2 + $0x88] sm:$0xff] %v285_v17  ;;  %v287_v19 = vld [vmem:[%s2354_s26 + $0x98] sm:$0xff]  ;;  %v288_v20 = vld [vmem:[%s2354_s26 + $0xa0] sm:$0xff] }
  0x7b   : > { %318 = vst [vmem:[#allocation2 + $0x90] sm:$0xff] %v286_v18  ;;  %319 = vst [vmem:[#allocation2 + $0x98] sm:$0xff] %v287_v19  ;;  %v289_v21 = vld [vmem:[%s2354_s26 + $0xa8] sm:$0xff]  ;;  %v290_v22 = vld [vmem:[%s2354_s26 + $0xb0] sm:$0xff] }
  0x7c   : > { %320 = vst [vmem:[#allocation2 + $0xa0] sm:$0xff] %v288_v20  ;;  %v291_v23 = vld [vmem:[%s2354_s26 + $0xb8] sm:$0xff]  ;;  %321 = vst [vmem:[#allocation2 + $0xa8] sm:$0xff] %v289_v21  ;;  %v292_v24 = vld [vmem:[%s2354_s26 + $0xc0] sm:$0xff] }
  0x7d   : > { %322 = vst [vmem:[#allocation2 + $0xb0] sm:$0xff] %v290_v22  ;;  %323 = vst [vmem:[#allocation2 + $0xb8] sm:$0xff] %v291_v23  ;;  %v293_v25 = vld [vmem:[%s2354_s26 + $0xc8] sm:$0xff]  ;;  %v294_v26 = vld [vmem:[%s2354_s26 + $0xd0] sm:$0xff] }
  0x7e   : > { %324 = vst [vmem:[#allocation2 + $0xc0] sm:$0xff] %v292_v24  ;;  %325 = vst [vmem:[#allocation2 + $0xc8] sm:$0xff] %v293_v25  ;;  %v295_v27 = vld [vmem:[%s2354_s26 + $0xd8] sm:$0xff]  ;;  %v296_v28 = vld [vmem:[%s2354_s26 + $0xe0] sm:$0xff] }
  0x7f   : > { %326 = vst [vmem:[#allocation2 + $0xd0] sm:$0xff] %v294_v26  ;;  %v297_v29 = vld [vmem:[%s2354_s26 + $0xe8] sm:$0xff]  ;;  %327 = vst [vmem:[#allocation2 + $0xd8] sm:$0xff] %v295_v27  ;;  %v298_v30 = vld [vmem:[%s2354_s26 + $0xf0] sm:$0xff] }
  0x80   : > { %328 = vst [vmem:[#allocation2 + $0xe0] sm:$0xff] %v296_v28  ;;  %329 = vst [vmem:[#allocation2 + $0xe8] sm:$0xff] %v297_v29  ;;  %v299_v31 = vld [vmem:[%s2354_s26 + $0xf8] sm:$0xff] }
  0x81   : > { %330 = vst [vmem:[#allocation2 + $0xf0] sm:$0xff] %v298_v30  ;;  %331 = vst [vmem:[#allocation2 + $0xf8] sm:$0xff] %v299_v31 }
  0x82 PF: > { %v1743_v32 = vld [vmem:[%s2361_s28 + $0x4] ss:$8 sps:$4 sm:$0xff]   ;;  %v1745_v33 = vld [vmem:[%s2361_s28] ss:$8 sps:$4 sm:$0xff]   ;;  %v1746_v34 = vld [vmem:[%s2361_s28 + $0x14] ss:$8 sps:$4 sm:$0xff]  }
  0x83   : > { %592 = vmatprep.subr.bf16.mxu0 %v1743_v32  ;;  %1598 = vmatprep.subr.bf16.mxu1 %v1743_v32  ;;  %v1748_v35 = vld [vmem:[%s2361_s28 + $0x10] ss:$8 sps:$4 sm:$0xff]   ;;  %v1749_v36 = vld [vmem:[%s2361_s28 + $0x24] ss:$8 sps:$4 sm:$0xff]   ;;  %v1751_v37 = vld [vmem:[%s2361_s28 + $0x20] ss:$8 sps:$4 sm:$0xff]  }
  0x84   : > { %593 = vmatpush1.bf16.msra.mxu0 %v1745_v33  ;;  %1614 = vmatpush1.bf16.msra.mxu1 %v1745_v33  ;;  %v1752_v38 = vld [vmem:[%s2361_s28 + $0x34] ss:$8 sps:$4 sm:$0xff]   ;;  %v1754_v39 = vld [vmem:[%s2361_s28 + $0x30] ss:$8 sps:$4 sm:$0xff]   ;;  %v1755_v40 = vld [vmem:[%s2361_s28 + $0x44] ss:$8 sps:$4 sm:$0xff]  }
  0x85   : > { %594 = vmatprep.subr.bf16.mxu0 %v1746_v34  ;;  %1599 = vmatprep.subr.bf16.mxu1 %v1746_v34  ;;  %v1757_v41 = vld [vmem:[%s2361_s28 + $0x40] ss:$8 sps:$4 sm:$0xff]   ;;  %v1758_v42 = vld [vmem:[%s2361_s28 + $0x54] ss:$8 sps:$4 sm:$0xff]   ;;  %v1760_v43 = vld [vmem:[%s2361_s28 + $0x50] ss:$8 sps:$4 sm:$0xff]  }
  0x86   : > { %v1761_v44 = vld [vmem:[%s2361_s28 + $0x64] ss:$8 sps:$4 sm:$0xff]   ;;  %v2424_v46 = vld [vmem:[#allocation2 + $0x18] sm:$0xff]  ;;  %v1763_v50 = vld [vmem:[%s2361_s28 + $0x60] ss:$8 sps:$4 sm:$0xff]   ;;  %p1585_p13 = scmp.ne.s32.totalorder %s2078_s18, 3 }
  0x87   : > { %v2422_v45 = vld [vmem:[#allocation2 + $0x8] sm:$0xff]  ;;  %v2428_v49 = vld [vmem:[#allocation2 + $0x98] sm:$0xff]  ;;  %v2450_v6 = vld [vmem:[#allocation2] sm:$0xff] }
  0x88   : > { %595 = vmatpush1.bf16.msra.mxu0 %v1748_v35  ;;  %1615 = vmatpush1.bf16.msra.mxu1 %v1748_v35  ;;  %v398_v47 = vpack.c.bf16 %v2424_v46, %v2422_v45  ;;  %v349_v48 = vld [vmem:[#allocation2 + $0x88] sm:$0xff]  ;;  %v1764_v52 = vld [vmem:[%s2361_s28 + $0x74] ss:$8 sps:$4 sm:$0xff]   ;;  %v1766_v53 = vld [vmem:[%s2361_s28 + $0x70] ss:$8 sps:$4 sm:$0xff]  }
  0x89   : > { %596 = vmatprep.subr.bf16.mxu0 %v1749_v36  ;;  %1600 = vmatprep.subr.bf16.mxu1 %v1749_v36  ;;  %v406_v51 = vpack.c.bf16 %v2428_v49, %v349_v48  ;;  %v1767_v54 = vld [vmem:[%s2361_s28 + $0x84] ss:$8 sps:$4 sm:$0xff]   ;;  %v1769_v55 = vld [vmem:[%s2361_s28 + $0x80] ss:$8 sps:$4 sm:$0xff]   ;;  %v1770_v56 = vld [vmem:[%s2361_s28 + $0x94] ss:$8 sps:$4 sm:$0xff]  }
  0x8a   : > { %624 = vmatprep.mubr.bf16.mxu0 %v398_v47  ;;  %v1772_v57 = vld [vmem:[%s2361_s28 + $0x90] ss:$8 sps:$4 sm:$0xff]   ;;  %v1773_v58 = vld [vmem:[%s2361_s28 + $0xa4] ss:$8 sps:$4 sm:$0xff]   ;;  %v1775_v59 = vld [vmem:[%s2361_s28 + $0xa0] ss:$8 sps:$4 sm:$0xff]  }
  0x8b   : > { %664 = vmatprep.mubr.bf16.mxu1 %v406_v51  ;;  %v1776_v60 = vld [vmem:[%s2361_s28 + $0xb4] ss:$8 sps:$4 sm:$0xff]   ;;  %v1778_v61 = vld [vmem:[%s2361_s28 + $0xb0] ss:$8 sps:$4 sm:$0xff]   ;;  %v1779_v62 = vld [vmem:[%s2361_s28 + $0xc4] ss:$8 sps:$4 sm:$0xff]   ;;  %v414_v51 = vlaneseq }
  0x8c   : > { %597 = vmatpush1.bf16.msra.mxu0 %v1751_v37  ;;  %1616 = vmatpush1.bf16.msra.mxu1 %v1751_v37  ;;  %v1781_v63 = vld [vmem:[%s2361_s28 + $0xc0] ss:$8 sps:$4 sm:$0xff]   ;;  %v1782_v0 = vld [vmem:[%s2361_s28 + $0xd4] ss:$8 sps:$4 sm:$0xff]   ;;  %v1784_v1 = vld [vmem:[%s2361_s28 + $0xd0] ss:$8 sps:$4 sm:$0xff]  }
  0x8d   : > { %598 = vmatprep.subr.bf16.mxu0 %v1752_v38  ;;  %1601 = vmatprep.subr.bf16.mxu1 %v1752_v38  ;;  %v1785_v2 = vld [vmem:[%s2361_s28 + $0xe4] ss:$8 sps:$4 sm:$0xff]   ;;  %v1787_v3 = vld [vmem:[%s2361_s28 + $0xe0] ss:$8 sps:$4 sm:$0xff]   ;;  %v1788_v4 = vld [vmem:[%s2361_s28 + $0xf4] ss:$8 sps:$4 sm:$0xff]  }
  0x8e   : > { %v1790_v5 = vld [vmem:[%s2361_s28 + $0xf0] ss:$8 sps:$4 sm:$0xff]   ;;  %v2454_v8 = vld [vmem:[#allocation2 + $0x80] sm:$0xff]  ;;  %v2458_v10 = vld [vmem:[#allocation2 + $0x28] sm:$0xff] }
  0x8f   : > { %v2452_v7 = vld [vmem:[#allocation2 + $0x10] sm:$0xff]  ;;  %v2460_v11 = vld [vmem:[#allocation2 + $0x38] sm:$0xff]  ;;  %v353_v12 = vld [vmem:[#allocation2 + $0xa8] sm:$0xff] }
  0x90   : > { %599 = vmatpush1.bf16.msra.mxu0 %v1754_v39  ;;  %1617 = vmatpush1.bf16.msra.mxu1 %v1754_v39  ;;  %v2456_v9 = vld [vmem:[#allocation2 + $0x90] sm:$0xff]  ;;  %v355_v13 = vld [vmem:[#allocation2 + $0xb8] sm:$0xff]  ;;  %v397_v14 = vpack.c.bf16 %v2452_v7, %v2450_v6  ;;  %v400_v16 = vpack.c.bf16 %v2460_v11, %v2458_v10  ;;  %v2468_v18 = vld [vmem:[#allocation2 + $0x20] sm:$0xff] }
  0x91   : > { %600 = vmatprep.subr.bf16.mxu0 %v1755_v40  ;;  %1602 = vmatprep.subr.bf16.mxu1 %v1755_v40  ;;  %v405_v15 = vpack.c.bf16 %v2456_v9, %v2454_v8  ;;  %v408_v17 = vpack.c.bf16 %v355_v13, %v353_v12  ;;  %v2470_v19 = vld [vmem:[#allocation2 + $0x30] sm:$0xff]  ;;  %v352_v20 = vld [vmem:[#allocation2 + $0xa0] sm:$0xff]  ;;  %v341_v22 = vld [vmem:[#allocation2 + $0x48] sm:$0xff] }
  0x92   : > { %v354_v21 = vld [vmem:[#allocation2 + $0xb0] sm:$0xff]  ;;  %v343_v23 = vld [vmem:[#allocation2 + $0x58] sm:$0xff]  ;;  %v357_v24 = vld [vmem:[#allocation2 + $0xc8] sm:$0xff]  ;;  %v399_v26 = vpack.c.bf16 %v2470_v19, %v2468_v18 }
  0x93   : > { %v359_v25 = vld [vmem:[#allocation2 + $0xd8] sm:$0xff]  ;;  %v407_v27 = vpack.c.bf16 %v354_v21, %v352_v20  ;;  %v402_v28 = vpack.c.bf16 %v343_v23, %v341_v22  ;;  %v340_v30 = vld [vmem:[#allocation2 + $0x40] sm:$0xff]  ;;  %v342_v31 = vld [vmem:[#allocation2 + $0x50] sm:$0xff] }
  0x94   : > { %601 = vmatpush1.bf16.msra.mxu0 %v1757_v41  ;;  %1618 = vmatpush1.bf16.msra.mxu1 %v1757_v41  ;;  %v410_v29 = vpack.c.bf16 %v359_v25, %v357_v24  ;;  %v356_v32 = vld [vmem:[#allocation2 + $0xc0] sm:$0xff]  ;;  %v358_v33 = vld [vmem:[#allocation2 + $0xd0] sm:$0xff]  ;;  %v345_v34 = vld [vmem:[#allocation2 + $0x68] sm:$0xff]  ;;  %v401_v38 = vpack.c.bf16 %v342_v31, %v340_v30 }
  0x95   : > { %602 = vmatprep.subr.bf16.mxu0 %v1758_v42  ;;  %1603 = vmatprep.subr.bf16.mxu1 %v1758_v42  ;;  %v347_v35 = vld [vmem:[#allocation2 + $0x78] sm:$0xff]  ;;  %v361_v36 = vld [vmem:[#allocation2 + $0xe8] sm:$0xff]  ;;  %v409_v39 = vpack.c.bf16 %v358_v33, %v356_v32  ;;  %v344_v42 = vld [vmem:[#allocation2 + $0x60] sm:$0xff] }
  0x96   : > { %v363_v37 = vld [vmem:[#allocation2 + $0xf8] sm:$0xff]  ;;  %v404_v40 = vpack.c.bf16 %v347_v35, %v345_v34  ;;  %v362_v47 = vld [vmem:[#allocation2 + $0xf0] sm:$0xff] }
  0x97   : > { %v412_v41 = vpack.c.bf16 %v363_v37, %v361_v36 }
  0x98   : > { %603 = vmatpush1.bf16.msra.mxu0 %v1760_v43  ;;  %1619 = vmatpush1.bf16.msra.mxu1 %v1760_v43  ;;  %v346_v43 = vld [vmem:[#allocation2 + $0x70] sm:$0xff] }
  0x99   : > { %604 = vmatprep.subr.bf16.mxu0 %v1761_v44  ;;  %1604 = vmatprep.subr.bf16.mxu1 %v1761_v44  ;;  %v360_v44 = vld [vmem:[#allocation2 + $0xe0] sm:$0xff]  ;;  %v403_v48 = vpack.c.bf16 %v346_v43, %v344_v42 }
  0x9c   : > { %605 = vmatpush1.bf16.msra.mxu0 %v1763_v50  ;;  %1620 = vmatpush1.bf16.msra.mxu1 %v1763_v50  ;;  %v411_v50 = vpack.c.bf16 %v362_v47, %v360_v44 }
  0x9d   : > { %606 = vmatprep.subr.bf16.mxu0 %v1764_v52  ;;  %1605 = vmatprep.subr.bf16.mxu1 %v1764_v52  ;;  %v2474_v52 = vshrl.u32 %v414_v51, 7 }
  0xa0   : > { %607 = vmatpush1.bf16.msra.mxu0 %v1766_v53  ;;  %1621 = vmatpush1.bf16.msra.mxu1 %v1766_v53  ;;  %v416_v53 = vsub.s32 0, %v2474_v52 }
  0xa1   : > { %608 = vmatprep.subr.bf16.mxu0 %v1767_v54  ;;  %1606 = vmatprep.subr.bf16.mxu1 %v1767_v54  ;;  %v2478_v54 = vld [vmem:[%s2372_s5] sm:$0x77] }
  0xa4   : > { %609 = vmatpush1.bf16.msra.mxu0 %v1769_v55  ;;  %1622 = vmatpush1.bf16.msra.mxu1 %v1769_v55  ;;  %v420_v55 = vsub.s32 4, %v2474_v52 }
  0xa5   : > { %610 = vmatprep.subr.bf16.mxu0 %v1770_v56  ;;  %1607 = vmatprep.subr.bf16.mxu1 %v1770_v56  ;;  %v417_v56 = vrot.slane %v2478_v54, %v416_v53 }
  0xa8   : > { %611 = vmatpush1.bf16.msra.mxu0 %v1772_v57  ;;  %1623 = vmatpush1.bf16.msra.mxu1 %v1772_v57  ;;  %v421_v57 = vrot.slane %v2478_v54, %v420_v55 }
  0xa9   : > { %612 = vmatprep.subr.bf16.mxu0 %v1773_v58  ;;  %1608 = vmatprep.subr.bf16.mxu1 %v1773_v58  ;;  %v2483_v58 = vrot.slane %v417_v56, %v416_v53 }
  0xac   : > { %613 = vmatpush1.bf16.msra.mxu0 %v1775_v59  ;;  %1624 = vmatpush1.bf16.msra.mxu1 %v1775_v59  ;;  %v2485_v59 = vrot.slane %v421_v57, %v416_v53 }
  0xad   : > { %614 = vmatprep.subr.bf16.mxu0 %v1776_v60  ;;  %1609 = vmatprep.subr.bf16.mxu1 %v1776_v60 }
  0xb0   : > { %615 = vmatpush1.bf16.msra.mxu0 %v1778_v61  ;;  %1625 = vmatpush1.bf16.msra.mxu1 %v1778_v61 }
  0xb1   : > { %616 = vmatprep.subr.bf16.mxu0 %v1779_v62  ;;  %1610 = vmatprep.subr.bf16.mxu1 %v1779_v62 }
  0xb4   : > { %617 = vmatpush1.bf16.msra.mxu0 %v1781_v63  ;;  %1626 = vmatpush1.bf16.msra.mxu1 %v1781_v63 }
  0xb5   : > { %618 = vmatprep.subr.bf16.mxu0 %v1782_v0  ;;  %1611 = vmatprep.subr.bf16.mxu1 %v1782_v0 }
  0xb8   : > { %619 = vmatpush1.bf16.msra.mxu0 %v1784_v1  ;;  %1627 = vmatpush1.bf16.msra.mxu1 %v1784_v1 }
  0xb9   : > { %620 = vmatprep.subr.bf16.mxu0 %v1785_v2  ;;  %1612 = vmatprep.subr.bf16.mxu1 %v1785_v2 }
  0xbc   : > { %621 = vmatpush1.bf16.msra.mxu0 %v1787_v3  ;;  %1628 = vmatpush1.bf16.msra.mxu1 %v1787_v3 }
  0xbd   : > { %622 = vmatprep.subr.bf16.mxu0 %v1788_v4  ;;  %1613 = vmatprep.subr.bf16.mxu1 %v1788_v4 }
  0xc0   : > { %623 = vmatpush1.bf16.msra.mxu0 %v1790_v5  ;;  %1629 = vmatpush1.bf16.msra.mxu1 %v1790_v5 }
  0xc3   : > { %625 = vmatmul.mubr.bf16.vlgmr.msra.gmra.mrb[0].mxu0 %v397_v14  ;;  %665 = vmatmul.mubr.bf16.vlgmr.msra.gmra.mrb[0].mxu1 %v405_v15 }
  0xc4   : > { %634 = vmatprep.mubr.bf16.mxu0 %v400_v16  ;;  %674 = vmatprep.mubr.bf16.mxu1 %v408_v17 }
  0xcb   : > { %635 = vmatmul.mubr.bf16.gmra.mrb[4].mxu0 %v399_v26  ;;  %675 = vmatmul.mubr.bf16.gmra.mrb[4].mxu1 %v407_v27 }
  0xcc   : > { %644 = vmatprep.mubr.bf16.mxu0 %v402_v28  ;;  %684 = vmatprep.mubr.bf16.mxu1 %v410_v29 }
  0xd3   : > { %645 = vmatmul.mubr.bf16.gmra.mrb[8].mxu0 %v401_v38  ;;  %685 = vmatmul.mubr.bf16.gmra.mrb[8].mxu1 %v409_v39 }
  0xd4   : > { %654 = vmatprep.mubr.bf16.mxu0 %v404_v40  ;;  %694 = vmatprep.mubr.bf16.mxu1 %v412_v41 }
  0xdb   : > { %655 = vmatmul.mubr.bf16.gmra.mrb[12].mxu0 %v403_v48  ;;  %695 = vmatmul.mubr.bf16.gmra.mrb[12].mxu1 %v411_v50 }
 0x196   : > { %v626_v60 = vpop.f32.mrb[0].mxu0  ;;  %v666_v61 = vpop.f32.mrb[0].mxu1 }
 0x197   : > { %v2488_v62 = vadd.f32 %v626_v60, %v2483_v58  ;;  %v628_v63 = vpop.f32.mrb[1].mxu0  ;;  %v668_v0 = vpop.f32.mrb[1].mxu1  ;;  %v2494_v4 = vadd.f32 %v666_v61, %v2483_v58 }
 0x198   : > { %v2491_v1 = vadd.f32 %v628_v63, %v2485_v59  ;;  %v630_v2 = vpop.f32.mrb[2].mxu0  ;;  %v670_v3 = vpop.f32.mrb[2].mxu1  ;;  %v2503_v15 = vadd.f32 %v668_v0, %v2485_v59 }
 0x199   : > { %v2497_v5 = vadd.f32 %v630_v2, %v2483_v58  ;;  %v2500_v12 = vadd.f32 %v670_v3, %v2483_v58  ;;  %v632_v13 = vpop.f32.mrb[3].mxu0  ;;  %v672_v14 = vpop.f32.mrb[3].mxu1  ;;  %v753_v35 = vmul.f32 %v2488_v62, %v2488_v62  ;;  %v769_v44 = vmul.f32 %v2494_v4, %v2494_v4 }
 0x19a   : > { %v2506_v16 = vadd.f32 %v632_v13, %v2485_v59  ;;  %v2509_v17 = vadd.f32 %v672_v14, %v2485_v59  ;;  %v705_v20 = vadd.f32 %v2491_v1, %v2488_v62  ;;  %v729_v24 = vadd.f32 %v2503_v15, %v2494_v4 }
 0x19b   : > { %v755_v22 = vmul.f32 %v2497_v5, %v2497_v5  ;;  %v771_v31 = vmul.f32 %v2500_v12, %v2500_v12  ;;  %v754_v40 = vmul.f32 %v2491_v1, %v2491_v1  ;;  %v770_v47 = vmul.f32 %v2503_v15, %v2503_v15 }
 0x19c   : > { %706 = vadd.xlane.f32.xlu0 %v705_v20  ;;  %v732_v21 = vadd.f32 %v2509_v17, %v2500_v12  ;;  %v756_v23 = vmul.f32 %v2506_v16, %v2506_v16  ;;  %v772_v32 = vmul.f32 %v2509_v17, %v2509_v17  ;;  %v708_v39 = vadd.f32 %v2506_v16, %v2497_v5 }
 0x19d   : > { %v785_v42 = vadd.f32 %v754_v40, %v753_v35  ;;  %v809_v3 = vadd.f32 %v770_v47, %v769_v44 }
 0x19e   : > { %733 = vadd.xlane.f32.xlu1 %v732_v21  ;;  %v636_v25 = vpop.f32.mrb[4].mxu0  ;;  %v676_v26 = vpop.f32.mrb[4].mxu1  ;;  %v788_v29 = vadd.f32 %v756_v23, %v755_v22  ;;  %v812_v41 = vadd.f32 %v772_v32, %v771_v31 }
 0x19f   : > { %v638_v27 = vpop.f32.mrb[5].mxu0  ;;  %v678_v28 = vpop.f32.mrb[5].mxu1  ;;  %v2528_v37 = vadd.f32 %v636_v25, %v2483_v58  ;;  %v2550_v57 = vadd.f32 %v676_v26, %v2483_v58 }
 0x1a0   : > { %730 = vadd.xlane.f32.xlu0 %v729_v24  ;;  %v640_v30 = vpop.f32.mrb[6].mxu0  ;;  %v680_v33 = vpop.f32.mrb[6].mxu1  ;;  %v2531_v38 = vadd.f32 %v638_v27, %v2485_v59  ;;  %v2553_v60 = vadd.f32 %v678_v28, %v2485_v59 }
 0x1a1   : > { %v642_v34 = vpop.f32.mrb[7].mxu0  ;;  %v682_v36 = vpop.f32.mrb[7].mxu1  ;;  %v2544_v55 = vadd.f32 %v640_v30, %v2483_v58  ;;  %v2556_v13 = vadd.f32 %v680_v33, %v2483_v58  ;;  %v757_v22 = vmul.f32 %v2528_v37, %v2528_v37 }
 0x1a2   : > { %789 = vadd.xlane.f32.xlu1 %v788_v29  ;;  %v711_v43 = vadd.f32 %v2531_v38, %v2528_v37  ;;  %v2547_v56 = vadd.f32 %v642_v34, %v2485_v59  ;;  %v2559_v14 = vadd.f32 %v682_v36, %v2485_v59  ;;  %v735_v21 = vadd.f32 %v2553_v60, %v2550_v57 }
 0x1a3   : > { %v758_v23 = vmul.f32 %v2531_v38, %v2531_v38  ;;  %v759_v29 = vmul.f32 %v2544_v55, %v2544_v55  ;;  %v773_v36 = vmul.f32 %v2550_v57, %v2550_v57  ;;  %v775_v40 = vmul.f32 %v2556_v13, %v2556_v13 }
 0x1a4   : > { %709 = vadd.xlane.f32.xlu0 %v708_v39  ;;  %v714_v20 = vadd.f32 %v2547_v56, %v2544_v55  ;;  %v738_v28 = vadd.f32 %v2559_v14, %v2556_v13  ;;  %v760_v30 = vmul.f32 %v2547_v56, %v2547_v56  ;;  %v774_v39 = vmul.f32 %v2553_v60, %v2553_v60 }
 0x1a5   : > { %v791_v35 = vadd.f32 %v758_v23, %v757_v22 }
 0x1a6   : > { %813 = vadd.xlane.f32.xlu1 %v812_v41  ;;  %v646_v48 = vpop.f32.mrb[8].mxu0  ;;  %v686_v50 = vpop.f32.mrb[8].mxu1  ;;  %v776_v41 = vmul.f32 %v2559_v14, %v2559_v14  ;;  %v794_v44 = vadd.f32 %v760_v30, %v759_v29  ;;  %v815_v47 = vadd.f32 %v774_v39, %v773_v36 }
 0x1a7   : > { %v648_v51 = vpop.f32.mrb[9].mxu0  ;;  %v688_v53 = vpop.f32.mrb[9].mxu1 }
 0x1a8   : > { %786 = vadd.xlane.f32.xlu0 %v785_v42  ;;  %v650_v61 = vpop.f32.mrb[10].mxu0  ;;  %v690_v63 = vpop.f32.mrb[10].mxu1  ;;  %v2584_v42 = vadd.f32 %v646_v48, %v2483_v58  ;;  %v2599_v48 = vadd.f32 %v688_v53, %v2485_v59 }
 0x1a9   : > { %v652_v0 = vpop.f32.mrb[11].mxu0  ;;  %v692_v2 = vpop.f32.mrb[11].mxu1  ;;  %v2604_v23 = vadd.f32 %v690_v63, %v2483_v58 }
 0x1aa   : > { %712 = vadd.xlane.f32.xlu1 %v711_v43  ;;  %v2587_v43 = vadd.f32 %v648_v51, %v2485_v59  ;;  %v2596_v22 = vadd.f32 %v652_v0, %v2485_v59  ;;  %v761_v53 = vmul.f32 %v2584_v42, %v2584_v42  ;;  %v778_v36 = vmul.f32 %v2599_v48, %v2599_v48 }
 0x1ab   : > { %v779_v39 = vmul.f32 %v2604_v23, %v2604_v23 }
 0x1ac   : > { %810 = vadd.xlane.f32.xlu0 %v809_v3  ;;  %v2590_v3 = vadd.f32 %v686_v50, %v2483_v58  ;;  %v717_v51 = vadd.f32 %v2587_v43, %v2584_v42  ;;  %v2607_v50 = vadd.f32 %v692_v2, %v2485_v59  ;;  %v764_v29 = vmul.f32 %v2596_v22, %v2596_v22 }
 0x1ae   : > { %715 = vadd.xlane.f32.xlu1 %v714_v20  ;;  %v656_v24 = vpop.f32.mrb[12].mxu0  ;;  %v696_v25 = vpop.f32.mrb[12].mxu1  ;;  %v818_v20 = vadd.f32 %v776_v41, %v775_v40  ;;  %3148 = vst [vmem:[#allocation15_spill] sm:$0xff] %v2607_v50  ;;  %v741_v0 = vadd.f32 %v2599_v48, %v2590_v3  ;;  %v744_v63 = vadd.f32 %v2607_v50, %v2604_v23 }
 0x1af   : > { %v658_v26 = vpop.f32.mrb[13].mxu0  ;;  %v698_v27 = vpop.f32.mrb[13].mxu1  ;;  %v780_v40 = vmul.f32 %v2607_v50, %v2607_v50  ;;  %v2632_v41 = vadd.f32 %v656_v24, %v2483_v58 }
 0x1b0   : > { %736 = vadd.xlane.f32.xlu0 %v735_v21  ;;  %v660_v31 = vpop.f32.mrb[14].mxu0  ;;  %v700_v32 = vpop.f32.mrb[14].mxu1  ;;  %v2593_v21 = vadd.f32 %v650_v61, %v2483_v58  ;;  %v2647_v24 = vadd.f32 %v698_v27, %v2485_v59 }
 0x1b1   : > { %v662_v33 = vpop.f32.mrb[15].mxu0  ;;  %v702_v34 = vpop.f32.mrb[15].mxu1  ;;  %3149 = vst [vmem:[#allocation16_spill] sm:$0xff] %v2632_v41  ;;  %v765_v27 = vmul.f32 %v2632_v41, %v2632_v41 }
 0x1b2   : > { %739 = vadd.xlane.f32.xlu1 %v738_v28  ;;  %v720_v61 = vadd.f32 %v2596_v22, %v2593_v21  ;;  %v762_v28 = vmul.f32 %v2587_v43, %v2587_v43  ;;  %v763_v2 = vmul.f32 %v2593_v21, %v2593_v21  ;;  %3154 = vst [vmem:[#allocation21_spill] sm:$0xff] %v2647_v24 }
 0x1b4   : > { %792 = vadd.xlane.f32.xlu0 %v791_v35  ;;  %v797_v30 = vadd.f32 %v762_v28, %v761_v53  ;;  %v777_v35 = vmul.f32 %v2590_v3, %v2590_v3  ;;  %v2644_v53 = vadd.f32 %v662_v33, %v2485_v59  ;;  %v2652_v28 = vadd.f32 %v700_v32, %v2483_v58 }
 0x1b6   : > { %795 = vadd.xlane.f32.xlu1 %v794_v44  ;;  %v2635_v44 = vadd.f32 %v658_v26, %v2485_v59  ;;  %3153 = vst [vmem:[#allocation20_spill] sm:$0xff] %v2644_v53  ;;  %3155 = vst [vmem:[#allocation22_spill] sm:$0xff] %v2652_v28  ;;  %v768_v32 = vmul.f32 %v2644_v53, %v2644_v53 }
 0x1b8   : > { %816 = vadd.xlane.f32.xlu0 %v815_v47  ;;  %3150 = vst [vmem:[#allocation17_spill] sm:$0xff] %v2635_v44  ;;  %v800_v47 = vadd.f32 %v764_v29, %v763_v2  ;;  %v723_v26 = vadd.f32 %v2635_v44, %v2632_v41  ;;  %v782_v29 = vmul.f32 %v2647_v24, %v2647_v24 }
 0x1ba   : > { %819 = vadd.xlane.f32.xlu1 %v818_v20  ;;  %v821_v20 = vadd.f32 %v778_v36, %v777_v35  ;;  %v783_v35 = vmul.f32 %v2652_v28, %v2652_v28 }
 0x1bc   : > { %718 = vadd.xlane.f32.xlu0 %v717_v51  ;;  %v2638_v51 = vadd.f32 %v696_v25, %v2483_v58  ;;  %v2655_v25 = vadd.f32 %v702_v34, %v2485_v59 }
 0x1be   : > { %721 = vadd.xlane.f32.xlu1 %v720_v61  ;;  %3151 = vst [vmem:[#allocation18_spill] sm:$0xff] %v2638_v51  ;;  %v824_v61 = vadd.f32 %v780_v40, %v779_v39  ;;  %3156 = vst [vmem:[#allocation23_spill] sm:$0xff] %v2655_v25  ;;  %v747_v33 = vadd.f32 %v2647_v24, %v2638_v51  ;;  %v781_v2 = vmul.f32 %v2638_v51, %v2638_v51 }
 0x1bf   : > { %v784_v36 = vmul.f32 %v2655_v25, %v2655_v25  ;;  %v1015_v24 = vsub.s32 5, %v2474_v52 }
 0x1c0   : > { %742 = vadd.xlane.f32.xlu0 %v741_v0  ;;  %v2641_v0 = vadd.f32 %v660_v31, %v2483_v58  ;;  %v750_v58 = vadd.f32 %v2655_v25, %v2652_v28  ;;  %v827_v39 = vadd.f32 %v782_v29, %v781_v2  ;;  %v1011_v25 = vsub.s32 1, %v2474_v52 }
 0x1c1   : > { %v830_v40 = vadd.f32 %v784_v36, %v783_v35 }
 0x1c2   : > { %745 = vadd.xlane.f32.xlu1 %v744_v63  ;;  %3152 = vst [vmem:[#allocation19_spill] sm:$0xff] %v2641_v0  ;;  %v726_v31 = vadd.f32 %v2644_v53, %v2641_v0  ;;  %v766_v63 = vmul.f32 %v2635_v44, %v2635_v44  ;;  %v767_v59 = vmul.f32 %v2641_v0, %v2641_v0 }
 0x1c4   : > { %798 = vadd.xlane.f32.xlu0 %v797_v30  ;;  %v803_v34 = vadd.f32 %v766_v63, %v765_v27  ;;  %v806_v30 = vadd.f32 %v768_v32, %v767_v59 }
 0x1c6   : > { %801 = vadd.xlane.f32.xlu1 %v800_v47 }
 0x1c8   : > { %822 = vadd.xlane.f32.xlu0 %v821_v20 }
 0x1ca   : > { %825 = vadd.xlane.f32.xlu1 %v824_v61 }
 0x1cc   : > { %724 = vadd.xlane.f32.xlu0 %v723_v26 }
 0x1ce   : > { %727 = vadd.xlane.f32.xlu1 %v726_v31 }
 0x1d0   : > { %748 = vadd.xlane.f32.xlu0 %v747_v33 }
 0x1d2   : > { %751 = vadd.xlane.f32.xlu1 %v750_v58 }
 0x1d4   : > { %804 = vadd.xlane.f32.xlu0 %v803_v34 }
 0x1d6   : > { %807 = vadd.xlane.f32.xlu1 %v806_v30 }
 0x1d8   : > { %828 = vadd.xlane.f32.xlu0 %v827_v39 }
 0x1da   : > { %831 = vadd.xlane.f32.xlu1 %v830_v40 }
 0x229   : > { %v707_v47 = vpop.xlane.xlu0 %706 }
 0x22a   : > { %v2681_v27 = vmul.f32 0.00390625, %v707_v47 }
 0x22b   : > { %v734_v20 = vpop.xlane.xlu1 %733 }
 0x22c   : > { %v2679_v31 = vmul.f32 0.00390625, %v734_v20  ;;  %v865_v36 = vmul.f32 %v2681_v27, %v2681_v27 }
 0x22d   : > { %v731_v61 = vpop.xlane.xlu0 %730 }
 0x22e   : > { %v874_v34 = vmul.f32 %v2679_v31, %v2679_v31  ;;  %v2691_v40 = vmul.f32 0.00390625, %v731_v61 }
 0x22f   : > { %v790_v26 = vpop.xlane.xlu1 %789 }
 0x230   : > { %v850_v59 = vmul.f32 0.00390625, %v790_v26  ;;  %v873_v61 = vmul.f32 %v2691_v40, %v2691_v40 }
 0x231   : > { %v710_v33 = vpop.xlane.xlu0 %709 }
 0x232   : > { %v2683_v63 = vmul.f32 0.00390625, %v710_v33 }
 0x233   : > { %v814_v58 = vpop.xlane.xlu1 %813 }
 0x234   : > { %v866_v32 = vmul.f32 %v2683_v63, %v2683_v63  ;;  %v858_v2 = vmul.f32 0.00390625, %v814_v58 }
 0x235   : > { %v787_v29 = vpop.xlane.xlu0 %786 }
 0x236   : > { %v882_v30 = vsub.f32 %v850_v59, %v866_v32  ;;  %v890_v35 = vsub.f32 %v858_v2, %v874_v34  ;;  %v849_v39 = vmul.f32 0.00390625, %v787_v29  ;;  %v1061_v59 = vsub.s32 2, %v2474_v52 }
 0x237   : > { %v713_v47 = vpop.xlane.xlu1 %712  ;;  %v1065_v32 = vsub.s32 6, %v2474_v52 }
 0x238   : > { %v898_v20 = vmax.f32 %v882_v30, 0.0  ;;  %v906_v33 = vmax.f32 %v890_v35, 0.0  ;;  %v881_v26 = vsub.f32 %v849_v39, %v865_v36  ;;  %v1012_v36 = vrot.slane %v2478_v54, %v1011_v25 }
 0x239   : > { %v811_v28 = vpop.xlane.xlu0 %810  ;;  %v1016_v39 = vrot.slane %v2478_v54, %v1015_v24  ;;  %v1066_v52 = vrot.slane %v2478_v54, %v1065_v32 }
 0x23a   : > { %v946_v51 = vadd.f32 1e-05, %v898_v20  ;;  %v954_v58 = vadd.f32 1e-05, %v906_v33  ;;  %v897_v53 = vmax.f32 %v881_v26, 0.0  ;;  %v857_v34 = vmul.f32 0.00390625, %v811_v28 }
 0x23b   : > { %v716_v2 = vpop.xlane.xlu1 %715  ;;  %v2701_v20 = vmul.f32 0.00390625, %v713_v47  ;;  %v1062_v33 = vrot.slane %v2478_v54, %v1061_v59 }
 0x23c   : > { %1791 = vrsqrt.f32 %v946_v51  ;;  %v945_v29 = vadd.f32 1e-05, %v897_v53  ;;  %v889_v30 = vsub.f32 %v857_v34, %v873_v61  ;;  %v2705_v28 = vmul.f32 0.00390625, %v716_v2 }
 0x23d   : > { %1793 = vrsqrt.f32 %v954_v58  ;;  %v737_v35 = vpop.xlane.xlu0 %736  ;;  %v2707_v58 = vrot.slane %v1012_v36, %v1011_v25  ;;  %v2709_v61 = vrot.slane %v1016_v39, %v1011_v25  ;;  %v867_v24 = vmul.f32 %v2701_v20, %v2701_v20 }
 0x23e   : > { %1795 = vrsqrt.f32 %v945_v29  ;;  %v905_v26 = vmax.f32 %v889_v30, 0.0  ;;  %v2713_v47 = vrot.slane %v1062_v33, %v1061_v59  ;;  %v2715_v29 = vrot.slane %v1066_v52, %v1061_v59 }
 0x23f   : > { %v740_v0 = vpop.xlane.xlu1 %739  ;;  %v2717_v54 = vmul.f32 0.00390625, %v737_v35  ;;  %v913_v2 = vsub.f32 %v2488_v62, %v2681_v27  ;;  %v868_v25 = vmul.f32 %v2705_v28, %v2705_v28  ;;  %v914_v39 = vsub.f32 %v2491_v1, %v2681_v27 }
 0x240   : > { %v953_v51 = vadd.f32 1e-05, %v905_v26  ;;  %v931_v33 = vsub.f32 %v2500_v12, %v2679_v31  ;;  %v915_v59 = vsub.f32 %v2497_v5, %v2683_v63  ;;  %v916_v35 = vsub.f32 %v2506_v16, %v2683_v63 }
 0x241   : > { %v793_v53 = vpop.xlane.xlu0 %792  ;;  %v932_v62 = vsub.f32 %v2509_v17, %v2679_v31  ;;  %v875_v12 = vmul.f32 %v2717_v54, %v2717_v54 }
 0x242   : > { %v851_v34 = vmul.f32 0.00390625, %v793_v53  ;;  %1797 = vrsqrt.f32 %v953_v51  ;;  %v929_v51 = vsub.f32 %v2494_v4, %v2691_v40 }
 0x243   : > { %v796_v32 = vpop.xlane.xlu1 %795 }
 0x244   : > { %v883_v30 = vsub.f32 %v851_v34, %v867_v24  ;;  %v852_v36 = vmul.f32 0.00390625, %v796_v32 }
 0x245   : > { %v817_v52 = vpop.xlane.xlu0 %816 }
 0x246   : > { %v1792_v26 = vpop.eup %1791  ;;  %v899_v53 = vmax.f32 %v883_v30, 0.0  ;;  %v884_v24 = vsub.f32 %v852_v36, %v868_v25  ;;  %v859_v5 = vmul.f32 0.00390625, %v817_v52 }
 0x247   : > { %v1794_v1 = vpop.eup %1793  ;;  %v979_v27 = vmul.f32 %v1792_v26, %v915_v59  ;;  %v980_v34 = vmul.f32 %v1792_v26, %v916_v35 }
 0x248   : > { %v1796_v32 = vpop.eup %1795  ;;  %v995_v44 = vmul.f32 %v1794_v1, %v931_v33  ;;  %v996_v16 = vmul.f32 %v1794_v1, %v932_v62  ;;  %v947_v63 = vadd.f32 1e-05, %v899_v53  ;;  %v900_v41 = vmax.f32 %v884_v24, 0.0  ;;  %v820_v24 = vpop.xlane.xlu1 %819 }
 0x249   : > { %v1029_v50 = vmul.f32 %v2707_v58, %v979_v27  ;;  %v1030_v17 = vmul.f32 %v2709_v61, %v980_v34  ;;  %v977_v31 = vmul.f32 %v1796_v32, %v913_v2  ;;  %v978_v4 = vmul.f32 %v1796_v32, %v914_v39 }
 0x24a   : > { %v1045_v30 = vmul.f32 %v2707_v58, %v995_v44  ;;  %v1046_v25 = vmul.f32 %v2709_v61, %v996_v16  ;;  %1799 = vrsqrt.f32 %v947_v63  ;;  %v948_v36 = vadd.f32 1e-05, %v900_v41 }
 0x24b   : > { %v1079_v59 = vadd.f32 %v2713_v47, %v1029_v50  ;;  %v1080_v35 = vadd.f32 %v2715_v29, %v1030_v17  ;;  %v1027_v33 = vmul.f32 %v2707_v58, %v977_v31  ;;  %v1028_v52 = vmul.f32 %v2709_v61, %v978_v4 }
 0x24c   : > { %v2746_v26 = vadd.f32 %v2713_v47, %v1045_v30  ;;  %v2749_v2 = vadd.f32 %v2715_v29, %v1046_v25  ;;  %1801 = vrsqrt.f32 %v948_v36  ;;  %v891_v44 = vsub.f32 %v859_v5, %v875_v12  ;;  %v1798_v39 = vpop.eup %1797  ;;  %v2776_v36 = vpop.xlane.xlu1 %721 }
 0x24d   : > { %v930_v41 = vsub.f32 %v2503_v15, %v2691_v40  ;;  %v1143_v62 = vmul.f32 0.70710677, %v1079_v59  ;;  %v1144_v50 = vmul.f32 0.70710677, %v1080_v35  ;;  %v2753_v53 = vmul.f32 0.00390625, %v740_v0 }
 0x24e   : > { %v1159_v1 = vmul.f32 0.70710677, %v2746_v26  ;;  %v1160_v27 = vmul.f32 0.70710677, %v2749_v2  ;;  %v917_v34 = vsub.f32 %v2528_v37, %v2701_v20  ;;  %v918_v32 = vsub.f32 %v2531_v38, %v2701_v20  ;;  %v2769_v38 = vpop.xlane.xlu0 %718 }
 0x24f   : > { %1803 = verf.f32 %v1143_v62  ;;  %v1077_v12 = vadd.f32 %v2713_v47, %v1027_v33  ;;  %v2763_v15 = vadd.f32 %v2715_v29, %v1028_v52  ;;  %v993_v40 = vmul.f32 %v1798_v39, %v929_v51 }
 0x250   : > { %1805 = verf.f32 %v1144_v50  ;;  %v994_v0 = vmul.f32 %v1798_v39, %v930_v41  ;;  %v907_v5 = vmax.f32 %v891_v44, 0.0  ;;  %v860_v16 = vmul.f32 0.00390625, %v820_v24 }
 0x251   : > { %1807 = verf.f32 %v1159_v1  ;;  %v1141_v63 = vmul.f32 0.70710677, %v1077_v12  ;;  %v919_v17 = vsub.f32 %v2544_v55, %v2705_v28  ;;  %v876_v37 = vmul.f32 %v2753_v53, %v2753_v53 }
 0x252   : > { %1809 = verf.f32 %v1160_v27  ;;  %v1142_v20 = vmul.f32 0.70710677, %v2763_v15  ;;  %v1043_v31 = vmul.f32 %v2707_v58, %v993_v40  ;;  %v1044_v51 = vmul.f32 %v2709_v61, %v994_v0 }
 0x253   : > { %1811 = verf.f32 %v1141_v63  ;;  %v920_v4 = vsub.f32 %v2547_v56, %v2705_v28  ;;  %v955_v30 = vadd.f32 1e-05, %v907_v5  ;;  %v892_v25 = vsub.f32 %v860_v16, %v876_v37 }
 0x254   : > { %v1800_v55 = vpop.eup %1799  ;;  %1813 = verf.f32 %v1142_v20  ;;  %v2779_v33 = vadd.f32 %v2713_v47, %v1043_v31  ;;  %v2782_v52 = vadd.f32 %v2715_v29, %v1044_v51  ;;  %v933_v44 = vsub.f32 %v2550_v57, %v2717_v54 }
 0x255   : > { %v981_v39 = vmul.f32 %v1800_v55, %v917_v34  ;;  %v982_v41 = vmul.f32 %v1800_v55, %v918_v32  ;;  %1815 = vrsqrt.f32 %v955_v30  ;;  %v908_v62 = vmax.f32 %v892_v25, 0.0  ;;  %v2794_v32 = vpop.xlane.xlu0 %742  ;;  %v2803_v30 = vpop.xlane.xlu1 %745 }
 0x256   : > { %v1802_v56 = vpop.eup %1801  ;;  %v1157_v28 = vmul.f32 0.70710677, %v2779_v33  ;;  %v1158_v50 = vmul.f32 0.70710677, %v2782_v52  ;;  %v934_v24 = vsub.f32 %v2553_v60, %v2717_v54  ;;  %v1111_v5 = vmul.f32 0.5, %v1079_v59 }
 0x257   : > { %v1031_v27 = vmul.f32 %v2707_v58, %v981_v39  ;;  %v1032_v40 = vmul.f32 %v2709_v61, %v982_v41  ;;  %v983_v0 = vmul.f32 %v1802_v56, %v919_v17  ;;  %v984_v34 = vmul.f32 %v1802_v56, %v920_v4 }
 0x258   : > { %v1112_v16 = vmul.f32 0.5, %v1080_v35  ;;  %1817 = verf.f32 %v1157_v28  ;;  %v956_v63 = vadd.f32 1e-05, %v908_v62  ;;  %v1127_v25 = vmul.f32 0.5, %v2746_v26 }
 0x259   : > { %v1804_v37 = vpop.eup %1803  ;;  %1819 = verf.f32 %v1158_v50  ;;  %v2797_v20 = vadd.f32 %v2713_v47, %v1031_v27  ;;  %v2800_v31 = vadd.f32 %v2715_v29, %v1032_v40  ;;  %v1033_v51 = vmul.f32 %v2707_v58, %v983_v0 }
 0x25a   : > { %v1806_v17 = vpop.eup %1805  ;;  %v1207_v4 = vadd.f32 1.0, %v1804_v37  ;;  %v1034_v59 = vmul.f32 %v2709_v61, %v984_v34  ;;  %1821 = vrsqrt.f32 %v956_v63  ;;  %v1128_v39 = vmul.f32 0.5, %v2749_v2  ;;  %v2816_v63 = vpop.xlane.xlu0 %798 }
 0x25b   : > { %v1808_v35 = vpop.eup %1807  ;;  %v1208_v55 = vadd.f32 1.0, %v1806_v17  ;;  %v1109_v41 = vmul.f32 0.5, %v1077_v12  ;;  %v1145_v62 = vmul.f32 0.70710677, %v2797_v20  ;;  %v1146_v27 = vmul.f32 0.70710677, %v2800_v31 }
 0x25c   : > { %v1810_v56 = vpop.eup %1809  ;;  %v1239_v28 = vmul.f32 %v1207_v4, %v1111_v5  ;;  %v1223_v50 = vadd.f32 1.0, %v1808_v35  ;;  %v2811_v40 = vadd.f32 %v2713_v47, %v1033_v51  ;;  %v2814_v34 = vadd.f32 %v2715_v29, %v1034_v59 }
 0x25d   : > { %v1812_v0 = vpop.eup %1811  ;;  %v1240_v26 = vmul.f32 %v1208_v55, %v1112_v16  ;;  %v1224_v37 = vadd.f32 1.0, %v1810_v56  ;;  %1823 = verf.f32 %v1145_v62  ;;  %v1110_v1 = vmul.f32 0.5, %v2763_v15  ;;  %v2821_v55 = vpop.xlane.xlu1 %801 }
 0x25e   : > { %v1814_v2 = vpop.eup %1813  ;;  %v1271_v12 = vadd.f32 %v1239_v28, %v2452_v7  ;;  %v1255_v17 = vmul.f32 %v1223_v50, %v1127_v25  ;;  %v1205_v5 = vadd.f32 1.0, %v1812_v0  ;;  %1825 = verf.f32 %v1146_v27 }
 0x25f   : > { %v1816_v4 = vpop.eup %1815  ;;  %v1272_v35 = vadd.f32 %v1240_v26, %v2424_v46  ;;  %v1256_v51 = vmul.f32 %v1224_v37, %v1128_v39  ;;  %v1206_v16 = vadd.f32 1.0, %v1814_v2  ;;  %v936_v56 = vsub.f32 %v2559_v14, %v2753_v53 }
 0x260   : > { %1303 = vst [vmem:[#allocation2 + $0x10] sm:$0xff] %v1271_v12  ;;  %v1287_v59 = vadd.f32 %v1255_v17, %v2456_v9  ;;  %v1237_v62 = vmul.f32 %v1205_v5, %v1109_v41  ;;  %v1147_v7 = vmul.f32 0.70710677, %v2811_v40  ;;  %v1148_v46 = vmul.f32 0.70710677, %v2814_v34 }
 0x261   : > { %1304 = vst [vmem:[#allocation2 + $0x18] sm:$0xff] %v1272_v35  ;;  %v1288_v25 = vadd.f32 %v1256_v51, %v2428_v49  ;;  %v1238_v28 = vmul.f32 %v1206_v16, %v1110_v1  ;;  %v997_v15 = vmul.f32 %v1816_v4, %v933_v44  ;;  %v1125_v41 = vmul.f32 0.5, %v2779_v33  ;;  %v823_v44 = vpop.xlane.xlu0 %822  ;;  %v826_v37 = vpop.xlane.xlu1 %825  ;;  %v1887_v16 = vld [vmem:[#allocation2 + $0x88] sm:$0xff] }
 0x262   : > { %v1818_v39 = vpop.eup %1817  ;;  %1319 = vst [vmem:[#allocation2 + $0x90] sm:$0xff] %v1287_v59  ;;  %v1269_v9 = vadd.f32 %v1237_v62, %v2450_v6  ;;  %1827 = verf.f32 %v1147_v7  ;;  %v998_v14 = vmul.f32 %v1816_v4, %v934_v24  ;;  %v1126_v6 = vmul.f32 0.5, %v2782_v52 }
 0x263   : > { %v1820_v50 = vpop.eup %1819  ;;  %1320 = vst [vmem:[#allocation2 + $0x98] sm:$0xff] %v1288_v25  ;;  %v1270_v49 = vadd.f32 %v1238_v28, %v2422_v45  ;;  %v1221_v1 = vadd.f32 1.0, %v1818_v39  ;;  %1829 = verf.f32 %v1148_v46  ;;  %v1047_v57 = vmul.f32 %v2707_v58, %v997_v15 }
 0x264   : > { %v1822_v27 = vpop.eup %1821  ;;  %1301 = vst [vmem:[#allocation2] sm:$0xff] %v1269_v9  ;;  %v1222_v0 = vadd.f32 1.0, %v1820_v50  ;;  %v1048_v33 = vmul.f32 %v2709_v61, %v998_v14  ;;  %v3157_v45 = vsub.f32 %v2556_v13, %v2753_v53  ;;  %v2851_v52 = vmul.f32 0.00390625, %v2769_v38 }
 0x265   : > { %1302 = vst [vmem:[#allocation2 + $0x8] sm:$0xff] %v1270_v49  ;;  %v1253_v26 = vmul.f32 %v1221_v1, %v1125_v41  ;;  %v2842_v60 = vadd.f32 %v2713_v47, %v1047_v57  ;;  %v1000_v24 = vmul.f32 %v1822_v27, %v936_v56  ;;  %v2854_v17 = vmul.f32 0.00390625, %v2776_v36  ;;  %v2875_v41 = vpop.xlane.xlu1 %727 }
 0x266   : > { %v999_v54 = vmul.f32 %v1822_v27, %v3157_v45  ;;  %v1254_v2 = vmul.f32 %v1222_v0, %v1126_v6  ;;  %v2848_v12 = vadd.f32 %v2715_v29, %v1048_v33  ;;  %v1113_v35 = vmul.f32 0.5, %v2797_v20  ;;  %v725_v20 = vpop.xlane.xlu0 %724 }
 0x267   : > { %v1824_v5 = vpop.eup %1823  ;;  %v1285_v4 = vadd.f32 %v1253_v26, %v2454_v8  ;;  %v1161_v13 = vmul.f32 0.70710677, %v2842_v60  ;;  %v1114_v62 = vmul.f32 0.5, %v2800_v31  ;;  %v1050_v7 = vmul.f32 %v2709_v61, %v1000_v24 }
 0x268   : > { %v1049_v53 = vmul.f32 %v2707_v58, %v999_v54  ;;  %v1826_v51 = vpop.eup %1825  ;;  %v1286_v59 = vadd.f32 %v1887_v16, %v1254_v2  ;;  %v1209_v56 = vadd.f32 1.0, %v1824_v5  ;;  %v1162_v38 = vmul.f32 0.70710677, %v2848_v12 }
 0x269   : > { %1317 = vst [vmem:[#allocation2 + $0x80] sm:$0xff] %v1285_v4  ;;  %v1210_v36 = vadd.f32 1.0, %v1826_v51  ;;  %1831 = verf.f32 %v1161_v13  ;;  %v1115_v28 = vmul.f32 0.5, %v2811_v40  ;;  %v1116_v46 = vmul.f32 0.5, %v2814_v34  ;;  %v752_v13 = vpop.xlane.xlu1 %751 }
 0x26a   : > { %v2864_v8 = vadd.f32 %v2713_v47, %v1049_v53  ;;  %1318 = vst [vmem:[#allocation2 + $0x88] sm:$0xff] %v1286_v59  ;;  %v1241_v25 = vmul.f32 %v1209_v56, %v1113_v35  ;;  %1833 = verf.f32 %v1162_v38  ;;  %v2869_v15 = vadd.f32 %v2715_v29, %v1050_v7 }
 0x26b   : > { %v1242_v31 = vmul.f32 %v1210_v36, %v1114_v62  ;;  %v2873_v9 = vmul.f32 0.00390625, %v2794_v32  ;;  %v2879_v49 = vmul.f32 0.00390625, %v2803_v30  ;;  %v869_v40 = vmul.f32 %v2851_v52, %v2851_v52 }
 0x26c   : > { %v1163_v39 = vmul.f32 0.70710677, %v2864_v8  ;;  %v1828_v14 = vpop.eup %1827  ;;  %v1273_v50 = vadd.f32 %v1241_v25, %v2468_v18  ;;  %v853_v34 = vmul.f32 0.00390625, %v2816_v63  ;;  %v1164_v32 = vmul.f32 0.70710677, %v2869_v15 }
 0x26d   : > { %v1830_v1 = vpop.eup %1829  ;;  %v1274_v57 = vadd.f32 %v1242_v31, %v2458_v10  ;;  %v1211_v27 = vadd.f32 1.0, %v1828_v14  ;;  %v870_v6 = vmul.f32 %v2854_v17, %v2854_v17  ;;  %v854_v30 = vmul.f32 0.00390625, %v2821_v55  ;;  %v749_v10 = vpop.xlane.xlu0 %748 }
 0x26e   : > { %1305 = vst [vmem:[#allocation2 + $0x20] sm:$0xff] %v1273_v50  ;;  %v1212_v0 = vadd.f32 1.0, %v1830_v1  ;;  %1835 = verf.f32 %v1163_v39  ;;  %v885_v18 = vsub.f32 %v853_v34, %v869_v40  ;;  %v877_v63 = vmul.f32 %v2873_v9, %v2873_v9  ;;  %v808_v14 = vpop.xlane.xlu1 %807  ;;  %v1888_v40 = vld [vmem:[#allocation2 + $0xa0] sm:$0xff] }
 0x26f   : > { %1306 = vst [vmem:[#allocation2 + $0x28] sm:$0xff] %v1274_v57  ;;  %v1243_v33 = vmul.f32 %v1211_v27, %v1115_v28  ;;  %1837 = verf.f32 %v1164_v32  ;;  %v861_v26 = vmul.f32 0.00390625, %v823_v44  ;;  %v886_v24 = vsub.f32 %v854_v30, %v870_v6  ;;  %v1889_v27 = vld [vmem:[#allocation2 + $0xa8] sm:$0xff] }
 0x270   : > { %v1244_v45 = vmul.f32 %v1212_v0, %v1116_v46  ;;  %v901_v54 = vmax.f32 %v885_v18, 0.0  ;;  %v878_v4 = vmul.f32 %v2879_v49, %v2879_v49  ;;  %v862_v35 = vmul.f32 0.00390625, %v826_v37 }
 0x271   : > { %v1275_v2 = vadd.f32 %v1243_v33, %v2470_v19  ;;  %v893_v5 = vsub.f32 %v861_v26, %v877_v63  ;;  %v902_v51 = vmax.f32 %v886_v24, 0.0  ;;  %v1129_v56 = vmul.f32 0.5, %v2842_v60  ;;  %v805_v28 = vpop.xlane.xlu0 %804 }
 0x272   : > { %v1276_v55 = vadd.f32 %v1244_v45, %v2460_v11  ;;  %v949_v53 = vadd.f32 1e-05, %v901_v54  ;;  %v894_v44 = vsub.f32 %v862_v35, %v878_v4  ;;  %v1130_v36 = vmul.f32 0.5, %v2848_v12  ;;  %v1890_v54 = vld [vmem:[#allocation2 + $0xb0] sm:$0xff] }
 0x273   : > { %v1832_v16 = vpop.eup %1831  ;;  %1307 = vst [vmem:[#allocation2 + $0x30] sm:$0xff] %v1275_v2  ;;  %v909_v59 = vmax.f32 %v893_v5, 0.0  ;;  %v950_v19 = vadd.f32 1e-05, %v902_v51  ;;  %v2897_v46 = vmul.f32 0.00390625, %v725_v20  ;;  %v1131_v34 = vmul.f32 0.5, %v2864_v8 }
 0x274   : > { %v1834_v62 = vpop.eup %1833  ;;  %1308 = vst [vmem:[#allocation2 + $0x38] sm:$0xff] %v1276_v55  ;;  %v1225_v38 = vadd.f32 1.0, %v1832_v16  ;;  %1839 = vrsqrt.f32 %v949_v53  ;;  %v910_v25 = vmax.f32 %v894_v44, 0.0  ;;  %v921_v12 = vsub.f32 %v2584_v42, %v2851_v52  ;;  %v3158_v53 = vld [vmem:[#allocation15_spill] sm:$0xff] }
 0x275   : > { %v1226_v7 = vadd.f32 1.0, %v1834_v62  ;;  %v957_v37 = vadd.f32 1e-05, %v909_v59  ;;  %1841 = vrsqrt.f32 %v950_v19  ;;  %v922_v1 = vsub.f32 %v2587_v43, %v2851_v52  ;;  %v829_v33 = vpop.xlane.xlu0 %828 }
 0x276   : > { %v1257_v11 = vmul.f32 %v1225_v38, %v1129_v56  ;;  %v958_v39 = vadd.f32 1e-05, %v910_v25  ;;  %v1132_v20 = vmul.f32 0.5, %v2869_v15  ;;  %v2906_v18 = vmul.f32 0.00390625, %v2875_v41 }
 0x277   : > { %v1258_v31 = vmul.f32 %v1226_v7, %v1130_v36  ;;  %1843 = vrsqrt.f32 %v957_v37  ;;  %v871_v8 = vmul.f32 %v2897_v46, %v2897_v46  ;;  %v855_v30 = vmul.f32 0.00390625, %v805_v28 }
 0x278   : > { %v1836_v50 = vpop.eup %1835  ;;  %v1289_v60 = vadd.f32 %v1888_v40, %v1257_v11  ;;  %1845 = vrsqrt.f32 %v958_v39  ;;  %v923_v43 = vsub.f32 %v2593_v21, %v2854_v17  ;;  %v924_v52 = vsub.f32 %v2596_v22, %v2854_v17  ;;  %v832_v22 = vpop.xlane.xlu1 %831 }
 0x279   : > { %v1838_v57 = vpop.eup %1837  ;;  %v1290_v32 = vadd.f32 %v1889_v27, %v1258_v31  ;;  %v1227_v6 = vadd.f32 1.0, %v1836_v50  ;;  %v2914_v15 = vmul.f32 0.00390625, %v749_v10  ;;  %v2916_v26 = vmul.f32 0.00390625, %v752_v13  ;;  %v1891_v10 = vld [vmem:[#allocation2 + $0xb8] sm:$0xff] }
 0x27a   : > { %1321 = vst [vmem:[#allocation2 + $0xa0] sm:$0xff] %v1289_v60  ;;  %v1228_v0 = vadd.f32 1.0, %v1838_v57  ;;  %v887_v41 = vsub.f32 %v855_v30, %v871_v8  ;;  %v856_v45 = vmul.f32 0.00390625, %v808_v14  ;;  %v937_v2 = vsub.f32 %v2590_v3, %v2873_v9 }
 0x27b   : > { %1322 = vst [vmem:[#allocation2 + $0xa8] sm:$0xff] %v1290_v32  ;;  %v1259_v42 = vmul.f32 %v1227_v6, %v1131_v34  ;;  %v938_v5 = vsub.f32 %v2599_v48, %v2873_v9  ;;  %v939_v21 = vsub.f32 %v2604_v23, %v2879_v49  ;;  %v872_v13 = vmul.f32 %v2906_v18, %v2906_v18 }
 0x27c   : > { %v1260_v63 = vmul.f32 %v1228_v0, %v1132_v20  ;;  %v903_v35 = vmax.f32 %v887_v41, 0.0  ;;  %v863_v55 = vmul.f32 0.00390625, %v829_v33  ;;  %v940_v51 = vsub.f32 %v3158_v53, %v2879_v49 }
 0x27d   : > { %v1291_v24 = vadd.f32 %v1890_v54, %v1259_v42  ;;  %v879_v48 = vmul.f32 %v2914_v15, %v2914_v15  ;;  %v888_v59 = vsub.f32 %v856_v45, %v872_v13  ;;  %v880_v44 = vmul.f32 %v2916_v26, %v2916_v26 }
 0x27e   : > { %v1840_v17 = vpop.eup %1839  ;;  %v1292_v4 = vadd.f32 %v1891_v10, %v1260_v63  ;;  %v951_v23 = vadd.f32 1e-05, %v903_v35  ;;  %v864_v62 = vmul.f32 0.00390625, %v832_v22 }
 0x27f   : > { %1323 = vst [vmem:[#allocation2 + $0xb0] sm:$0xff] %v1291_v24  ;;  %v985_v3 = vmul.f32 %v1840_v17, %v921_v12  ;;  %v986_v16 = vmul.f32 %v1840_v17, %v922_v1  ;;  %v1842_v9 = vpop.eup %1841  ;;  %v895_v25 = vsub.f32 %v863_v55, %v879_v48  ;;  %v904_v42 = vmax.f32 %v888_v59, 0.0  ;;  %v3159_v24 = vld [vmem:[#allocation16_spill] sm:$0xff] }
 0x280   : > { %1324 = vst [vmem:[#allocation2 + $0xb8] sm:$0xff] %v1292_v4  ;;  %v987_v36 = vmul.f32 %v1842_v9, %v923_v43  ;;  %v988_v49 = vmul.f32 %v1842_v9, %v924_v52  ;;  %1847 = vrsqrt.f32 %v951_v23  ;;  %v896_v57 = vsub.f32 %v864_v62, %v880_v44 }
 0x281   : > { %v1844_v56 = vpop.eup %1843  ;;  %v1035_v38 = vmul.f32 %v2707_v58, %v985_v3  ;;  %v1036_v19 = vmul.f32 %v2709_v61, %v986_v16  ;;  %v911_v43 = vmax.f32 %v895_v25, 0.0  ;;  %v952_v10 = vadd.f32 1e-05, %v904_v42  ;;  %v3161_v16 = vld [vmem:[#allocation19_spill] sm:$0xff]  ;;  %v1893_v42 = vld [vmem:[#allocation2 + $0x48] sm:$0xff] }
 0x282   : > { %v1001_v7 = vmul.f32 %v1844_v56, %v937_v2  ;;  %v1002_v37 = vmul.f32 %v1844_v56, %v938_v5  ;;  %v1846_v28 = vpop.eup %1845  ;;  %v1037_v39 = vmul.f32 %v2707_v58, %v987_v36  ;;  %v1038_v14 = vmul.f32 %v2709_v61, %v988_v49  ;;  %v3160_v5 = vld [vmem:[#allocation17_spill] sm:$0xff]  ;;  %v3162_v56 = vld [vmem:[#allocation20_spill] sm:$0xff]  ;;  %v3163_v49 = vld [vmem:[#allocation18_spill] sm:$0xff] }
 0x283   : > { %v1085_v11 = vadd.f32 %v2713_v47, %v1035_v38  ;;  %v1086_v31 = vadd.f32 %v2715_v29, %v1036_v19  ;;  %v1003_v60 = vmul.f32 %v1846_v28, %v939_v21  ;;  %v1004_v34 = vmul.f32 %v1846_v28, %v940_v51 }
 0x284   : > { %v1051_v50 = vmul.f32 %v2707_v58, %v1001_v7  ;;  %v1052_v40 = vmul.f32 %v2709_v61, %v1002_v37  ;;  %v1087_v27 = vadd.f32 %v2713_v47, %v1037_v39  ;;  %v1088_v32 = vadd.f32 %v2715_v29, %v1038_v14  ;;  %v3164_v39 = vld [vmem:[#allocation21_spill] sm:$0xff] }
 0x285   : > { %v1149_v12 = vmul.f32 0.70710677, %v1085_v11  ;;  %v1150_v1 = vmul.f32 0.70710677, %v1086_v31  ;;  %v1053_v0 = vmul.f32 %v2707_v58, %v1003_v60  ;;  %v1054_v8 = vmul.f32 %v2709_v61, %v1004_v34 }
 0x286   : > { %v2943_v20 = vadd.f32 %v2713_v47, %v1051_v50  ;;  %v2946_v6 = vadd.f32 %v2715_v29, %v1052_v40  ;;  %v1151_v30 = vmul.f32 0.70710677, %v1087_v27  ;;  %v1152_v52 = vmul.f32 0.70710677, %v1088_v32  ;;  %v3165_v50 = vld [vmem:[#allocation22_spill] sm:$0xff] }
 0x287   : > { %1849 = verf.f32 %v1149_v12  ;;  %v912_v63 = vmax.f32 %v896_v57, 0.0  ;;  %v2953_v45 = vadd.f32 %v2713_v47, %v1053_v0  ;;  %v2956_v54 = vadd.f32 %v2715_v29, %v1054_v8 }
 0x288   : > { %1851 = verf.f32 %v1150_v1  ;;  %v1165_v33 = vmul.f32 0.70710677, %v2943_v20  ;;  %v1166_v41 = vmul.f32 0.70710677, %v2946_v6  ;;  %v925_v2 = vsub.f32 %v3159_v24, %v2897_v46  ;;  %v1892_v1 = vld [vmem:[#allocation2 + $0x40] sm:$0xff] }
 0x289   : > { %1853 = verf.f32 %v1151_v30  ;;  %v926_v21 = vsub.f32 %v3160_v5, %v2897_v46  ;;  %v1167_v17 = vmul.f32 0.70710677, %v2953_v45  ;;  %v959_v4 = vadd.f32 1e-05, %v911_v43 }
 0x28a   : > { %1855 = verf.f32 %v1152_v52  ;;  %v1848_v22 = vpop.eup %1847  ;;  %v1168_v35 = vmul.f32 0.70710677, %v2956_v54  ;;  %v960_v53 = vadd.f32 1e-05, %v912_v63  ;;  %v927_v48 = vsub.f32 %v3161_v16, %v2906_v18 }
 0x28b   : > { %1857 = verf.f32 %v1165_v33  ;;  %v989_v13 = vmul.f32 %v1848_v22, %v925_v2  ;;  %v990_v55 = vmul.f32 %v1848_v22, %v926_v21  ;;  %v1117_v44 = vmul.f32 0.5, %v1085_v11  ;;  %v3166_v2 = vld [vmem:[#allocation23_spill] sm:$0xff] }
 0x28c   : > { %1859 = verf.f32 %v1166_v41  ;;  %v928_v38 = vsub.f32 %v3162_v56, %v2906_v18  ;;  %v1118_v19 = vmul.f32 0.5, %v1086_v31  ;;  %v941_v7 = vsub.f32 %v3163_v49, %v2914_v15  ;;  %v1898_v49 = vld [vmem:[#allocation2 + $0xd0] sm:$0xff] }
 0x28d   : > { %1861 = verf.f32 %v1167_v17  ;;  %v1039_v51 = vmul.f32 %v2707_v58, %v989_v13  ;;  %v1040_v3 = vmul.f32 %v2709_v61, %v990_v55  ;;  %v942_v14 = vsub.f32 %v3164_v39, %v2914_v15  ;;  %v1899_v39 = vld [vmem:[#allocation2 + $0xd8] sm:$0xff] }
 0x28e   : > { %1863 = verf.f32 %v1168_v35  ;;  %v943_v11 = vsub.f32 %v3165_v50, %v2916_v26  ;;  %v1119_v34 = vmul.f32 0.5, %v1087_v27  ;;  %v1120_v0 = vmul.f32 0.5, %v1088_v32  ;;  %v1894_v32 = vld [vmem:[#allocation2 + $0x50] sm:$0xff] }
 0x28f   : > { %1865 = vrsqrt.f32 %v952_v10  ;;  %v2969_v9 = vadd.f32 %v2713_v47, %v1039_v51  ;;  %v2972_v23 = vadd.f32 %v2715_v29, %v1040_v3  ;;  %v1133_v52 = vmul.f32 0.5, %v2943_v20  ;;  %v1895_v20 = vld [vmem:[#allocation2 + $0x58] sm:$0xff]  ;;  %v1896_v3 = vld [vmem:[#allocation2 + $0xc0] sm:$0xff] }
 0x290   : > { %1867 = vrsqrt.f32 %v959_v4  ;;  %v1134_v27 = vmul.f32 0.5, %v2946_v6  ;;  %v944_v5 = vsub.f32 %v3166_v2, %v2916_v26  ;;  %v1135_v10 = vmul.f32 0.5, %v2953_v45 }
 0x291   : > { %v1850_v46 = vpop.eup %1849  ;;  %1869 = vrsqrt.f32 %v960_v53  ;;  %v1153_v37 = vmul.f32 0.70710677, %v2969_v9  ;;  %v1154_v40 = vmul.f32 0.70710677, %v2972_v23  ;;  %v1136_v53 = vmul.f32 0.5, %v2956_v54 }
 0x292   : > { %v1852_v59 = vpop.eup %1851  ;;  %v1213_v62 = vadd.f32 1.0, %v1850_v46 }
 0x293   : > { %v1214_v36 = vadd.f32 1.0, %v1852_v59  ;;  %v1854_v25 = vpop.eup %1853  ;;  %1871 = verf.f32 %v1153_v37 }
 0x294   : > { %v1245_v28 = vmul.f32 %v1213_v62, %v1117_v44  ;;  %v1856_v60 = vpop.eup %1855  ;;  %v1215_v31 = vadd.f32 1.0, %v1854_v25  ;;  %1873 = verf.f32 %v1154_v40  ;;  %v1897_v62 = vld [vmem:[#allocation2 + $0xc8] sm:$0xff] }
 0x295   : > { %v1246_v18 = vmul.f32 %v1214_v36, %v1118_v19  ;;  %v1858_v12 = vpop.eup %1857  ;;  %v1216_v8 = vadd.f32 1.0, %v1856_v60 }
 0x296   : > { %v1277_v57 = vadd.f32 %v1892_v1, %v1245_v28  ;;  %v1860_v30 = vpop.eup %1859  ;;  %v1247_v15 = vmul.f32 %v1215_v31, %v1119_v34  ;;  %v1229_v33 = vadd.f32 1.0, %v1858_v12 }
 0x297   : > { %v1278_v43 = vadd.f32 %v1893_v42, %v1246_v18  ;;  %v1862_v63 = vpop.eup %1861  ;;  %v1248_v41 = vmul.f32 %v1216_v8, %v1120_v0  ;;  %v1230_v24 = vadd.f32 1.0, %v1860_v30  ;;  %v1122_v0 = vmul.f32 0.5, %v2972_v23 }
 0x298   : > { %1309 = vst [vmem:[#allocation2 + $0x40] sm:$0xff] %v1277_v57  ;;  %v1864_v21 = vpop.eup %1863  ;;  %v1279_v22 = vadd.f32 %v1894_v32, %v1247_v15  ;;  %v1261_v17 = vmul.f32 %v1229_v33, %v1133_v52  ;;  %v1231_v4 = vadd.f32 1.0, %v1862_v63 }
 0x299   : > { %1310 = vst [vmem:[#allocation2 + $0x48] sm:$0xff] %v1278_v43  ;;  %v1866_v35 = vpop.eup %1865  ;;  %v1280_v13 = vadd.f32 %v1895_v20, %v1248_v41  ;;  %v1262_v55 = vmul.f32 %v1230_v24, %v1134_v27  ;;  %v1232_v51 = vadd.f32 1.0, %v1864_v21  ;;  %v1901_v27 = vld [vmem:[#allocation2 + $0x68] sm:$0xff] }
 0x29a   : > { %v1868_v6 = vpop.eup %1867  ;;  %1311 = vst [vmem:[#allocation2 + $0x50] sm:$0xff] %v1279_v22  ;;  %v1293_v46 = vadd.f32 %v1896_v3, %v1261_v17  ;;  %v1263_v26 = vmul.f32 %v1231_v4, %v1135_v10  ;;  %v991_v16 = vmul.f32 %v1866_v35, %v927_v48  ;;  %v992_v59 = vmul.f32 %v1866_v35, %v928_v38 }
 0x29b   : > { %v1870_v44 = vpop.eup %1869  ;;  %1312 = vst [vmem:[#allocation2 + $0x58] sm:$0xff] %v1280_v13  ;;  %v1294_v56 = vadd.f32 %v1897_v62, %v1262_v55  ;;  %v1264_v45 = vmul.f32 %v1232_v51, %v1136_v53  ;;  %v1005_v19 = vmul.f32 %v1868_v6, %v941_v7  ;;  %v1006_v36 = vmul.f32 %v1868_v6, %v942_v14  ;;  %v1902_v51 = vld [vmem:[#allocation2 + $0x70] sm:$0xff] }
 0x29c   : > { %1325 = vst [vmem:[#allocation2 + $0xc0] sm:$0xff] %v1293_v46  ;;  %v1295_v37 = vadd.f32 %v1898_v49, %v1263_v26  ;;  %v1041_v54 = vmul.f32 %v2707_v58, %v991_v16  ;;  %v1042_v25 = vmul.f32 %v2709_v61, %v992_v59  ;;  %v1007_v28 = vmul.f32 %v1870_v44, %v943_v11  ;;  %v1903_v26 = vld [vmem:[#allocation2 + $0x78] sm:$0xff]  ;;  %v1905_v49 = vld [vmem:[#allocation2 + $0xe8] sm:$0xff] }
 0x29d   : > { %1326 = vst [vmem:[#allocation2 + $0xc8] sm:$0xff] %v1294_v56  ;;  %v1296_v50 = vadd.f32 %v1899_v39, %v1264_v45  ;;  %v1055_v48 = vmul.f32 %v2707_v58, %v1005_v19  ;;  %v1056_v38 = vmul.f32 %v2709_v61, %v1006_v36  ;;  %v1008_v40 = vmul.f32 %v1870_v44, %v944_v5  ;;  %v1872_v60 = vpop.eup %1871  ;;  %v1904_v56 = vld [vmem:[#allocation2 + $0xe0] sm:$0xff] }
 0x29e   : > { %1327 = vst [vmem:[#allocation2 + $0xd0] sm:$0xff] %v1295_v37  ;;  %v1121_v7 = vmul.f32 0.5, %v2969_v9  ;;  %v1091_v14 = vadd.f32 %v2713_v47, %v1041_v54  ;;  %v1092_v18 = vadd.f32 %v2715_v29, %v1042_v25  ;;  %v1057_v34 = vmul.f32 %v2707_v58, %v1007_v28  ;;  %v1874_v31 = vpop.eup %1873  ;;  %v1900_v58 = vld [vmem:[#allocation2 + $0x60] sm:$0xff]  ;;  %v1906_v28 = vld [vmem:[#allocation2 + $0xf0] sm:$0xff] }
 0x29f   : > { %1328 = vst [vmem:[#allocation2 + $0xd8] sm:$0xff] %v1296_v50  ;;  %v1217_v11 = vadd.f32 1.0, %v1872_v60  ;;  %v1105_v12 = vadd.f32 %v2713_v47, %v1055_v48  ;;  %v1106_v1 = vadd.f32 %v2715_v29, %v1056_v38  ;;  %v1058_v57 = vmul.f32 %v2709_v61, %v1008_v40  ;;  %v1907_v50 = vld [vmem:[#allocation2 + $0xf8] sm:$0xff]  ;;  %v1337_v38 = vld [vmem:[#allocation2] sm:$0xff] (!%p1585_p13)  ;;  %v1338_v40 = vld [vmem:[#allocation2 + $0x8] sm:$0xff] (!%p1585_p13) }
 0x2a0   : > { %v1218_v8 = vadd.f32 1.0, %v1874_v31  ;;  %v1155_v30 = vmul.f32 0.70710677, %v1091_v14  ;;  %v1156_v42 = vmul.f32 0.70710677, %v1092_v18  ;;  %v1107_v63 = vadd.f32 %v2713_v47, %v1057_v34  ;;  %v1339_v60 = vld [vmem:[#allocation2 + $0x10] sm:$0xff] (!%p1585_p13)  ;;  %1369 = vst [vmem:[%s2374_s10] sm:$0xff] (!%p1585_p13), %v1337_v38 }
 0x2a1   : > { %v1249_v9 = vmul.f32 %v1217_v11, %v1121_v7  ;;  %v1169_v15 = vmul.f32 0.70710677, %v1105_v12  ;;  %v1170_v52 = vmul.f32 0.70710677, %v1106_v1  ;;  %v1108_v41 = vadd.f32 %v2715_v29, %v1058_v57  ;;  %1370 = vst [vmem:[%s2374_s10 + $0x8] sm:$0xff] (!%p1585_p13), %v1338_v40  ;;  %1371 = vst [vmem:[%s2374_s10 + $0x10] sm:$0xff] (!%p1585_p13), %v1339_v60 }
 0x2a2   : > { %v1250_v43 = vmul.f32 %v1218_v8, %v1122_v0  ;;  %1875 = verf.f32 %v1155_v30  ;;  %v1171_v61 = vmul.f32 0.70710677, %v1107_v63  ;;  %v1123_v21 = vmul.f32 0.5, %v1091_v14  ;;  %v1340_v7 = vld [vmem:[#allocation2 + $0x18] sm:$0xff] (!%p1585_p13)  ;;  %v1341_v14 = vld [vmem:[#allocation2 + $0x20] sm:$0xff] (!%p1585_p13)  ;;  %v1343_v34 = vld [vmem:[#allocation2 + $0x30] sm:$0xff] (!%p1585_p13) }
 0x2a3   : > { %v1281_v33 = vadd.f32 %v1900_v58, %v1249_v9  ;;  %1877 = verf.f32 %v1156_v42  ;;  %v1172_v23 = vmul.f32 0.70710677, %v1108_v41  ;;  %v1124_v17 = vmul.f32 0.5, %v1092_v18  ;;  %v1342_v18 = vld [vmem:[#allocation2 + $0x28] sm:$0xff] (!%p1585_p13)  ;;  %1372 = vst [vmem:[%s2374_s10 + $0x18] sm:$0xff] (!%p1585_p13), %v1340_v7  ;;  %1373 = vst [vmem:[%s2374_s10 + $0x20] sm:$0xff] (!%p1585_p13), %v1341_v14 }
 0x2a4   : > { %v1282_v24 = vadd.f32 %v1901_v27, %v1250_v43  ;;  %1879 = verf.f32 %v1169_v15  ;;  %v1137_v29 = vmul.f32 0.5, %v1105_v12  ;;  %v1138_v13 = vmul.f32 0.5, %v1106_v1  ;;  %1374 = vst [vmem:[%s2374_s10 + $0x28] sm:$0xff] (!%p1585_p13), %v1342_v18  ;;  %v1344_v31 = vld [vmem:[#allocation2 + $0x38] sm:$0xff] (!%p1585_p13)  ;;  %v1345_v11 = vld [vmem:[#allocation2 + $0x40] sm:$0xff] (!%p1585_p13)  ;;  %1375 = vst [vmem:[%s2374_s10 + $0x30] sm:$0xff] (!%p1585_p13), %v1343_v34 }
 0x2a5   : > { %1313 = vst [vmem:[#allocation2 + $0x60] sm:$0xff] %v1281_v33  ;;  %1881 = verf.f32 %v1170_v52  ;;  %v1139_v44 = vmul.f32 0.5, %v1107_v63  ;;  %v1140_v19 = vmul.f32 0.5, %v1108_v41  ;;  %1376 = vst [vmem:[%s2374_s10 + $0x38] sm:$0xff] (!%p1585_p13), %v1344_v31  ;;  %v1346_v12 = vld [vmem:[#allocation2 + $0x48] sm:$0xff] (!%p1585_p13)  ;;  %v1347_v1 = vld [vmem:[#allocation2 + $0x50] sm:$0xff] (!%p1585_p13) }
 0x2a6   : > { %1314 = vst [vmem:[#allocation2 + $0x68] sm:$0xff] %v1282_v24  ;;  %1883 = verf.f32 %v1171_v61  ;;  %1377 = vst [vmem:[%s2374_s10 + $0x40] sm:$0xff] (!%p1585_p13), %v1345_v11  ;;  %v1348_v57 = vld [vmem:[#allocation2 + $0x58] sm:$0xff] (!%p1585_p13)  ;;  %v1353_v42 = vld [vmem:[#allocation2 + $0x80] sm:$0xff] (!%p1585_p13) }
 0x2a7   : > { %1885 = verf.f32 %v1172_v23  ;;  %1378 = vst [vmem:[%s2374_s10 + $0x48] sm:$0xff] (!%p1585_p13), %v1346_v12  ;;  %1379 = vst [vmem:[%s2374_s10 + $0x50] sm:$0xff] (!%p1585_p13), %v1347_v1  ;;  %v1354_v43 = vld [vmem:[#allocation2 + $0x88] sm:$0xff] (!%p1585_p13)  ;;  %v1355_v15 = vld [vmem:[#allocation2 + $0x90] sm:$0xff] (!%p1585_p13) }
 0x2a8   : > { %1380 = vst [vmem:[%s2374_s10 + $0x58] sm:$0xff] (!%p1585_p13), %v1348_v57  ;;  %1385 = vst [vmem:[%s2374_s10 + $0x80] sm:$0xff] (!%p1585_p13), %v1353_v42  ;;  %v1356_v52 = vld [vmem:[#allocation2 + $0x98] sm:$0xff] (!%p1585_p13)  ;;  %v1357_v58 = vld [vmem:[#allocation2 + $0xa0] sm:$0xff] (!%p1585_p13) }
 0x2a9   : > { %1386 = vst [vmem:[%s2374_s10 + $0x88] sm:$0xff] (!%p1585_p13), %v1354_v43  ;;  %1387 = vst [vmem:[%s2374_s10 + $0x90] sm:$0xff] (!%p1585_p13), %v1355_v15  ;;  %v1358_v33 = vld [vmem:[#allocation2 + $0xa8] sm:$0xff] (!%p1585_p13)  ;;  %v1359_v63 = vld [vmem:[#allocation2 + $0xb0] sm:$0xff] (!%p1585_p13) }
 0x2aa   : > { %1388 = vst [vmem:[%s2374_s10 + $0x98] sm:$0xff] (!%p1585_p13), %v1356_v52  ;;  %1389 = vst [vmem:[%s2374_s10 + $0xa0] sm:$0xff] (!%p1585_p13), %v1357_v58  ;;  %v1360_v41 = vld [vmem:[#allocation2 + $0xb8] sm:$0xff] (!%p1585_p13)  ;;  %v1361_v27 = vld [vmem:[#allocation2 + $0xc0] sm:$0xff] (!%p1585_p13) }
 0x2ab   : > { %1390 = vst [vmem:[%s2374_s10 + $0xa8] sm:$0xff] (!%p1585_p13), %v1358_v33  ;;  %1391 = vst [vmem:[%s2374_s10 + $0xb0] sm:$0xff] (!%p1585_p13), %v1359_v63  ;;  %v1362_v24 = vld [vmem:[#allocation2 + $0xc8] sm:$0xff] (!%p1585_p13)  ;;  %v1363_v61 = vld [vmem:[#allocation2 + $0xd0] sm:$0xff] (!%p1585_p13) }
 0x2ac   : > { %v1876_v2 = vpop.eup %1875  ;;  %v1349_v0 = vld [vmem:[#allocation2 + $0x60] sm:$0xff] (!%p1585_p13)  ;;  %1392 = vst [vmem:[%s2374_s10 + $0xb8] sm:$0xff] (!%p1585_p13), %v1360_v41  ;;  %1393 = vst [vmem:[%s2374_s10 + $0xc0] sm:$0xff] (!%p1585_p13), %v1361_v27  ;;  %v1364_v23 = vld [vmem:[#allocation2 + $0xd8] sm:$0xff] (!%p1585_p13) }
 0x2ad   : > { %v1878_v5 = vpop.eup %1877  ;;  %v1219_v32 = vadd.f32 1.0, %v1876_v2  ;;  %v1350_v8 = vld [vmem:[#allocation2 + $0x68] sm:$0xff] (!%p1585_p13)  ;;  %1381 = vst [vmem:[%s2374_s10 + $0x60] sm:$0xff] (!%p1585_p13), %v1349_v0  ;;  %1394 = vst [vmem:[%s2374_s10 + $0xc8] sm:$0xff] (!%p1585_p13), %v1362_v24 }
 0x2ae   : > { %v1880_v22 = vpop.eup %1879  ;;  %v1220_v10 = vadd.f32 1.0, %v1878_v5  ;;  %1382 = vst [vmem:[%s2374_s10 + $0x68] sm:$0xff] (!%p1585_p13), %v1350_v8  ;;  %1395 = vst [vmem:[%s2374_s10 + $0xd0] sm:$0xff] (!%p1585_p13), %v1363_v61 }
 0x2af   : > { %v1882_v47 = vpop.eup %1881  ;;  %v1251_v4 = vmul.f32 %v1219_v32, %v1123_v21  ;;  %v1233_v35 = vadd.f32 1.0, %v1880_v22  ;;  %1396 = vst [vmem:[%s2374_s10 + $0xd8] sm:$0xff] (!%p1585_p13), %v1364_v23 }
 0x2b0   : > { %v1252_v20 = vmul.f32 %v1220_v10, %v1124_v17  ;;  %v1234_v55 = vadd.f32 1.0, %v1882_v47  ;;  %v1884_v53 = vpop.eup %1883 }
 0x2b1   : > { %v1283_v6 = vadd.f32 %v1902_v51, %v1251_v4  ;;  %v1265_v3 = vmul.f32 %v1233_v35, %v1137_v29  ;;  %v1886_v46 = vpop.eup %1885  ;;  %v1235_v62 = vadd.f32 1.0, %v1884_v53 }
 0x2b2   : > { %v1284_v16 = vadd.f32 %v1903_v26, %v1252_v20  ;;  %v1266_v59 = vmul.f32 %v1234_v55, %v1138_v13  ;;  %v1236_v36 = vadd.f32 1.0, %v1886_v46  ;;  %1336 = sbr.rel (%p1585_p13) target bundleno = 705 (0x2c1), region = 48 }
 0x2b3   : > { %1315 = vst [vmem:[#allocation2 + $0x70] sm:$0xff] %v1283_v6  ;;  %v1297_v45 = vadd.f32 %v1904_v56, %v1265_v3  ;;  %v1267_v54 = vmul.f32 %v1235_v62, %v1139_v44 }
 0x2b4   : > { %1316 = vst [vmem:[#allocation2 + $0x78] sm:$0xff] %v1284_v16  ;;  %v1298_v37 = vadd.f32 %v1905_v49, %v1266_v59  ;;  %v1268_v25 = vmul.f32 %v1236_v36, %v1140_v19 }
 0x2b5   : > { %1329 = vst [vmem:[#allocation2 + $0xe0] sm:$0xff] %v1297_v45  ;;  %v1299_v39 = vadd.f32 %v1906_v28, %v1267_v54 }
 0x2b6   : > { %1330 = vst [vmem:[#allocation2 + $0xe8] sm:$0xff] %v1298_v37  ;;  %v1300_v48 = vadd.f32 %v1907_v50, %v1268_v25 }
 0x2b7   : > { %1331 = vst [vmem:[#allocation2 + $0xf0] sm:$0xff] %v1299_v39 }
 0x2b8   : > { %1332 = vst [vmem:[#allocation2 + $0xf8] sm:$0xff] %v1300_v48 }
 0x2ba   : > { %v1351_v30 = vld [vmem:[#allocation2 + $0x70] sm:$0xff] }
 0x2bb   : > { %1383 = vst [vmem:[%s2374_s10 + $0x70] sm:$0xff] %v1351_v30  ;;  %v1352_v9 = vld [vmem:[#allocation2 + $0x78] sm:$0xff] }
 0x2bc   : > { %1384 = vst [vmem:[%s2374_s10 + $0x78] sm:$0xff] %v1352_v9  ;;  %v1365_v2 = vld [vmem:[#allocation2 + $0xe0] sm:$0xff] }
 0x2bd   : > { %v1366_v5 = vld [vmem:[#allocation2 + $0xe8] sm:$0xff]  ;;  %1397 = vst [vmem:[%s2374_s10 + $0xe0] sm:$0xff] %v1365_v2 }
 0x2be   : > { %1398 = vst [vmem:[%s2374_s10 + $0xe8] sm:$0xff] %v1366_v5  ;;  %v1367_v21 = vld [vmem:[#allocation2 + $0xf0] sm:$0xff] }
 0x2bf   : > { %v1368_v32 = vld [vmem:[#allocation2 + $0xf8] sm:$0xff]  ;;  %1399 = vst [vmem:[%s2374_s10 + $0xf0] sm:$0xff] %v1367_v21 }
 0x2c0   : > { %1400 = vst [vmem:[%s2374_s10 + $0xf8] sm:$0xff] %v1368_v32 }
 0x2c1 PF: > { %s1597_s18 = sshll.u32 %s2082_s19, 12  ;;  %s1416_s26 = sshll.u32 %s2374_s10, 4  ;;  %s3044_s26 = int_to_ptr.vmem [resolvable:$true] %s1416_s26 }
 0x2c2   : > { %s3041_s12 = scalar_lea.hbm %s3110_s3, %s1597_s18  ;;  %s1402_s15 = scalar_lea.sflag [#allocation5], %s2350_s6 }
 0x2c3   : > { %s1968_s11 = scalar_lea.vmem %s3044_s26, 4096  ;;  %p3167_p0 = scmp.ne.s32.totalorder %s3133_s30, 0 }
 0x2c4   : > { %p1969_p12 = scmp.ne.s32.totalorder %s3044_s26, %s1968_s11  ;;  %s2102_s27 = smov [#allocation8]  }
 0x2c5   : > { %s1972_s28 = sshll.u32 %s2102_s27, 4  ;;  %s1973_s28 = int_to_ptr.vmem [resolvable:$false] %s1972_s28 }
 0x2c6   : > { %p1970_p5 = pnand %p1969_p12, %p3167_p0  ;;  %s1974_s19 = scalar_lea.vmem %s1973_s28, 8192 }
 0x2c7   : > { %p1975_p1 = scmp.lt.s32.totalorder %s3044_s26, %s1973_s28  ;;  %p1976_p9 = scmp.lt.s32.totalorder %s1974_s19, %s1968_s11 }
 0x2c8   : > { %p1971_p3 = pneg %p1970_p5 }
 0x2c9   : > { %p1977_p2 = por %p1976_p9, %p1975_p1 }
 0x2cb   : > { %p1978_p11 = pnand %p1977_p2, %p1971_p3 }
 0x2cd   : > { %1981 = shalt.err (!%p1978_p11)
}
 0x2ce   : > { %s1982_s7 = scalar_lea.hbm %s3041_s12, 4096  ;;  %s1986_s29 = scalar_lea.hbm %s3110_s3, 12288 }
 0x2cf   : > { %p1983_p7 = scmp.ne.s32.totalorder %s3041_s12, %s1982_s7  ;;  %p1987_p10 = scmp.lt.u32.totalorder %s3041_s12, %s3110_s3 }
 0x2d0   : > { %p1988_p6 = scmp.lt.u32.totalorder %s1986_s29, %s1982_s7  ;;  %p1990_p12 = scmp.lt.u32.totalorder %s1982_s7, %s3041_s12 }
 0x2d1   : > { %p1984_p4 = pnand %p1983_p7, %p3167_p0 }
 0x2d2   : > { %p1989_p13 = por %p1988_p6, %p1987_p10 }
 0x2d3   : > { %p1985_p8 = pneg %p1984_p4 }
 0x2d4   : > { %p1991_p5 = por %p1990_p12, %p1989_p13 }
 0x2d6   : > { %p1992_p3 = pnand %p1991_p5, %p1985_p8 }
 0x2d8   : > { %1995 = shalt.err (!%p1992_p3)
}
 0x2d9   : > { %s2103_s18 = smov 256   ;;  %s2104_s23 = smov 16  }
 0x2da   : > { %1634 = dma.vmem_to_hbm [thread:$0]  (%p3167_p0), %s3044_s26, 4096, %s3041_s12, %s1402_s15, %s2103_s18, %s2103_s18, %s2104_s23  }
 0x2db PF: > { %s3168_s8 = sld [smem:[#allocation12_spill]]  ;;  %s3169_s11 = sld [smem:[#allocation13_spill]] }
 0x2dc   : > { %p1648_p1 = scmp.ge.s32.totalorder %s2094_s22, 2 }
 0x2e1   : > { %s1431_s27 = sand.u32 1, %s3168_s8   ;;  %p3170_p9 = scmp.ne.s32.totalorder %s3169_s11, 0 }
 0x2e2   : > { %s1432_s28 = scalar_lea.sflag [#allocation5], %s1431_s27 }
 0x2e3   : > { %p1644_p2 = pnand %p1648_p1, %p3170_p9 }
 0x2e5   : > { %2049 = dma.done.wait (!%p1644_p2), %s1432_s28, 4096  }
 0x2e6   : > { %2051 = vsyncadd (!%p1644_p2), %s1432_s28, 4294963200  ;;  %s22_s22 = sadd.s32 1, %s2094_s22   ;;  %s3171_s30 = sld [smem:[#allocation14_spill]] }
 0x2e7   : > { %p19_p11 = scmp.ge.s32.totalorder %s22_s22, 14   ;;  %s3172_s12 = smov %s2058_s13 }
 0x2e8   : > { %s3173_s13 = smov %s2062_s14  ;;  %s3174_s14 = smov %s2294_s24 }
 0x2e9   : > { %s3175_s15 = smov %s2070_s16  ;;  %s3176_s16 = smov %s2074_s17 }
 0x2ea   : > { %s3177_s17 = smov %s2302_s0  ;;  %s3178_s18 = smov %s2086_s20 }
 0x2eb   : > { %s3179_s19 = smov %s2090_s21  ;;  %s3181_s21 = smov %s3187_s25 }
 0x2ec   : > { %s3180_s20 = smov %s3171_s30  ;;  %21 = sbr.rel (!%p19_p11) target bundleno = 13 (0xd), region = 101 }
 0x2f3   :  { %1437 = vsyncpa [#allocation4], 1 }
 0x2f4   :  { %1439 = vsyncpa [#allocation4 + $0x1], 1 }
 0x2f5   :  { %1440 = vsyncpa [#allocation7], 1 }
 0x2f6   :  { %1442 = vsyncpa [#allocation7 + $0x1], 1 }
 0x2f7   :  { %1443 = vsyncpa [#allocation5], 1 }
 0x2f8   :  { %1445 = vsyncpa [#allocation5 + $0x1], 1 }

</bundles_post_ra>
